<compile_context>
chip_gen: v7x
topology: tpu7x:2x2x1
jax: 0.10.0
libtpu: 0.0.40
codegen_flags: <defaults>
</compile_context>

<pallas_src>
import functools

import jax
import jax.numpy as jnp
from jax import lax
from jax.experimental import pallas as pl
from jax.experimental.pallas import tpu as pltpu


# ----------------------------------------------------------------------------
# Fused kernel: block-diagonal encoder + autoregressive decoder (fc folded in)
# ----------------------------------------------------------------------------
def fused_model_kernel(xf_ref,
                       w_ihe_ref, w_hhe_ref, be_ref,
                       w_hhd_ref, bd_ref,
                       w_hhd_eff_ref, bd_eff_ref,
                       fc_w_ref, fc_b_ref,
                       out_ref, *, T1, T2, B, Hh, H):
    n_out = out_ref.shape[1]
    Tmax = max(T1, T2)

    # g-lane mask shared by the fused encoder and the decoder (both have 4*H
    # gate lanes in PyTorch order i, f, g, o; each gate block is H lanes wide).
    lane = lax.broadcasted_iota(jnp.int32, (B, 4 * H), 1)
    g_mask = (lane >= 2 * H) & (lane < 3 * H)

    def lstm_cell(gates, c):
        """gates: (B, 4H), c: (B, H).  Single-EUP activation:
        tanh(x) = 2*sigmoid(2x) - 1  ->  g lanes pre-scaled by 2 (VPU),
        ONE sigmoid push (EUP), g lanes remapped with 2*s - 1 (VPU)."""
        scaled = jnp.where(g_mask, gates + gates, gates)
        s = jax.nn.sigmoid(scaled)
        act = jnp.where(g_mask, s + s - 1.0, s)
        i = act[:, 0:H]
        f = act[:, H:2 * H]
        g = act[:, 2 * H:3 * H]
        o = act[:, 3 * H:4 * H]
        c_new = f * c + i * g
        h_new = o * jnp.tanh(c_new)
        return h_new, c_new

    # --- fused block-diagonal encoder -----------------------------------------
    # Hoisted input projection: ONE batched MXU matmul, off the recurrent chain.
    x_proj = jnp.dot(xf_ref[...], w_ihe_ref[...],
                     preferred_element_type=jnp.float32) + be_ref[...]   # (Tmax*B, 4H)
    w_hhe = w_hhe_ref[...]

    # Pre-extract per-step tiles (B padded to a multiple of 8 -> each slice is a
    # whole sublane-aligned (8, 128) tile; extraction is off the serial chain).
    xsteps = [x_proj[t * B:(t + 1) * B, :] for t in range(Tmax)]

    if T1 != T2:  # only needed when the two encoder sequences differ in length
        half1 = lax.broadcasted_iota(jnp.int32, (B, H), 1) < Hh

    h = jnp.zeros((B, H), jnp.float32)
    c = jnp.zeros((B, H), jnp.float32)
    for t in range(Tmax):                                    # fully unrolled
        gates = xsteps[t] + jnp.dot(h, w_hhe, preferred_element_type=jnp.float32)
        h_new, c_new = lstm_cell(gates, c)
        if t < T1 and t < T2:
            h, c = h_new, c_new
        elif t < T1:        # encoder2 exhausted: freeze its half of the state
            h = jnp.where(half1, h_new, h)
            c = jnp.where(half1, c_new, c)
        else:               # encoder1 exhausted: freeze its half of the state
            h = jnp.where(half1, h, h_new)
            c = jnp.where(half1, c, c_new)
    # h == [h1 | h2], c == [c1 | c2]  (the torch.cat, for free)

    # --- decoder with fc folded into the recurrence ---------------------------
    #   step 0 (y seed = 0):  gates = h @ W_hh     + b
    #   steps >= 1:           gates = h @ W_hh_eff + b_eff
    # W_hh_eff / b_eff are precomputed in the wrapper.  Per-step critical path
    # is one MXU push + cell elementwise; y_t come from saved h_t after the loop.
    w_hhd = w_hhd_ref[...]
    bd = bd_ref[...]
    w_hhd_eff = w_hhd_eff_ref[...]
    bd_eff = bd_eff_ref[...]

    hs = []
    for step in range(n_out):                                # fully unrolled
        w = w_hhd if step == 0 else w_hhd_eff
        b = bd if step == 0 else bd_eff
        gates = jnp.dot(h, w, preferred_element_type=jnp.float32) + b
        h, c = lstm_cell(gates, c)
        hs.append(h)

    # fc outputs, off the serial dependency chain: multiply + lane reduction.
    fc_w = fc_w_ref[...]     # (1, H)   PyTorch fc.weight layout
    fc_b = fc_b_ref[...]     # (1, 1)
    ys = [jnp.sum(hh * fc_w, axis=-1, keepdims=True) + fc_b for hh in hs]

    # Single lane-dense store (no per-step 1-lane masked stores).
    out_ref[...] = jnp.concatenate(ys, axis=1)               # (B, n_out)


# ----------------------------------------------------------------------------
# Wrapper + weight packing
# ----------------------------------------------------------------------------
_VMEM = pl.BlockSpec(memory_space=pltpu.MemorySpace.VMEM)


def _fuse_gate_blockdiag(w1, w2, hh):
    """w1: (r1, 4*hh), w2: (r2, 4*hh) with columns in gate order i,f,g,o
    -> (r1+r2, 8*hh) block-diagonal-per-gate, lanes [i1|i2|f1|f2|g1|g2|o1|o2]."""
    r1, r2 = w1.shape[0], w2.shape[0]
    z1 = jnp.zeros((r1, hh), w1.dtype)
    z2 = jnp.zeros((r2, hh), w2.dtype)
    cols = []
    for g in range(4):
        top = jnp.concatenate([w1[:, g * hh:(g + 1) * hh], z1], axis=1)
        bot = jnp.concatenate([z2, w2[:, g * hh:(g + 1) * hh]], axis=1)
        cols.append(jnp.concatenate([top, bot], axis=0))
    return jnp.concatenate(cols, axis=1)


def _fuse_gate_bias(b1, b2, hh):
    parts = []
    for g in range(4):
        parts.append(b1[:, g * hh:(g + 1) * hh])
        parts.append(b2[:, g * hh:(g + 1) * hh])
    return jnp.concatenate(parts, axis=1)


@functools.partial(jax.jit, static_argnames=("n_timesteps_out",))
def model_preds_forward(params, x, preds, n_timesteps_out):
    """
    x:     (T1, B, input_size)
    preds: (T2, B, input_size - 1)
    Returns stacked outputs of shape (n_timesteps_out, 1, B, 1)
    (== torch.stack(all_outputs) from the PyTorch module; decoder is seeded
    with zeros, exactly like the reference).
    """
    e1, e2, dec, fc = (params["encoder1"], params["encoder2"],
                       params["decoder"], params["fc"])

    T1, B, D1 = x.shape
    T2, _, D2 = preds.shape
    Hh = e1["w_hh"].shape[0]          # encoder hidden size (= hidden_size // 2)
    H = dec["w_hh"].shape[0]          # decoder hidden size (= 2 * Hh)
    Tmax = max(T1, T2)

    # Pad batch up to a sublane multiple (>= 8): free, keeps all slices aligned.
    B_pad = max(8, ((B + 7) // 8) * 8)

    # Concatenate both encoders' features (zero-padded) for one input projection.
    xf = jnp.zeros((Tmax, B_pad, D1 + D2), jnp.float32)
    xf = xf.at[:T1, :B, :D1].set(x)
    xf = xf.at[:T2, :B, D1:].set(preds)
    xf2d = xf.reshape(Tmax * B_pad, D1 + D2)

    # Fused block-diagonal encoder weights ([i1|i2|f1|f2|g1|g2|o1|o2] lanes).
    w_ihe = _fuse_gate_blockdiag(e1["w_ih"], e2["w_ih"], Hh)   # (D1+D2, 4H)
    w_hhe = _fuse_gate_blockdiag(e1["w_hh"], e2["w_hh"], Hh)   # (H, 4H)
    b_e = _fuse_gate_bias(e1["b"], e2["b"], Hh)                # (1, 4H)

    # Decoder with fc folded into the recurrence (steps >= 1).
    w_hhd = dec["w_hh"]                       # (H, 4H)
    bd = dec["b"]                             # (1, 4H)
    w_ihd = dec["w_ih"]                       # (1, 4H)
    fc_w = fc["w"]                            # (1, H)
    fc_b = fc["b"]                            # (1, 1)
    w_hhd_eff = w_hhd + fc_w.T @ w_ihd        # (H, 4H)
    bd_eff = bd + fc_b * w_ihd                # (1, 4H)

    kernel = functools.partial(fused_model_kernel,
                               T1=T1, T2=T2, B=B_pad, Hh=Hh, H=H)

    out = pl.pallas_call(
        kernel,
        out_shape=jax.ShapeDtypeStruct((B_pad, n_timesteps_out), jnp.float32),
        in_specs=[_VMEM] * 10,
        out_specs=_VMEM,
    )(xf2d, w_ihe, w_hhe, b_e, w_hhd, bd, w_hhd_eff, bd_eff, fc_w, fc_b)

    # (B_pad, n_out) -> drop padding -> (n_out, 1, B, 1) to match the PyTorch stack.
    return jnp.transpose(out[:B], (1, 0))[:, None, :, None]


# ----------------------------------------------------------------------------
# Parameter init (mirrors PyTorch defaults)
# ----------------------------------------------------------------------------
def init_lstm_params(key, input_size, hidden_size):
    """PyTorch-style uniform(-1/sqrt(H), 1/sqrt(H)); biases ih+hh combined."""
    k = 1.0 / jnp.sqrt(hidden_size)
    k1, k2, k3, k4 = jax.random.split(key, 4)
    w_ih = jax.random.uniform(k1, (4 * hidden_size, input_size), jnp.float32, -k, k)
    w_hh = jax.random.uniform(k2, (4 * hidden_size, hidden_size), jnp.float32, -k, k)
    b_ih = jax.random.uniform(k3, (4 * hidden_size,), jnp.float32, -k, k)
    b_hh = jax.random.uniform(k4, (4 * hidden_size,), jnp.float32, -k, k)
    return dict(
        w_ih=w_ih.T,                    # (input_size, 4H)
        w_hh=w_hh.T,                    # (H, 4H)
        b=(b_ih + b_hh)[None, :],       # (1, 4H)
    )


def init_fc_params(key, in_features, out_features):
    k = 1.0 / jnp.sqrt(in_features)
    k1, k2 = jax.random.split(key)
    w = jax.random.uniform(k1, (out_features, in_features), jnp.float32, -k, k)
    b = jax.random.uniform(k2, (out_features,), jnp.float32, -k, k)
    return dict(w=w, b=b[None, :])      # (1, H) PyTorch layout, (1, 1)


def init_model_params(key, input_size, hidden_size):
    k1, k2, k3, k4 = jax.random.split(key, 4)
    return dict(
        encoder1=init_lstm_params(k1, input_size, hidden_size // 2),
        encoder2=init_lstm_params(k2, input_size - 1, hidden_size // 2),
        decoder=init_lstm_params(k3, 1, hidden_size),
        fc=init_fc_params(k4, hidden_size, 1),
    )


# ----------------------------------------------------------------------------
if __name__ == "__main__":
    input_size = 4
    hidden_size = 32
    n_timesteps_out = 5
    batch = 2
    T1, T2 = 8, 8

    key = jax.random.PRNGKey(0)
    kp, kx, kpr = jax.random.split(key, 3)

    params = init_model_params(kp, input_size, hidden_size)
    x = jax.random.normal(kx, (T1, batch, input_size), jnp.float32)
    preds = jax.random.normal(kpr, (T2, batch, input_size - 1), jnp.float32)

    out = model_preds_forward(params, x, preds, n_timesteps_out)
    out = jax.block_until_ready(out)
    assert out.shape == (n_timesteps_out, 1, batch, 1)
    assert jnp.all(jnp.isfinite(out))
    print("KERNEL_OK")
</pallas_src>

<mosaic_0001>
module attributes {stable_mosaic.version = 11 : i64} {
  func.func @fused_model_kernel(%arg0: memref<64x7xf32, #tpu.memory_space<vmem>>, %arg1: memref<7x128xf32, #tpu.memory_space<vmem>>, %arg2: memref<32x128xf32, #tpu.memory_space<vmem>>, %arg3: memref<1x128xf32, #tpu.memory_space<vmem>>, %arg4: memref<32x128xf32, #tpu.memory_space<vmem>>, %arg5: memref<1x128xf32, #tpu.memory_space<vmem>>, %arg6: memref<32x128xf32, #tpu.memory_space<vmem>>, %arg7: memref<1x128xf32, #tpu.memory_space<vmem>>, %arg8: memref<1x32xf32, #tpu.memory_space<vmem>>, %arg9: memref<1x1xf32, #tpu.memory_space<vmem>>, %arg10: memref<8x5xf32, #tpu.memory_space<vmem>>) attributes {dimension_semantics = [], scalar_prefetch = 0 : i64, scratch_operands = 0 : i64, tpu.core_type = #tpu.core_type<tc>} {
    %0 = tpu.iota {dimensions = array<i32: 1>} : vector<8x128xi32>
    %c64_i32 = arith.constant 64 : i32
    %1 = vector.broadcast %c64_i32 : i32 to vector<8x128xi32>
    %2 = arith.cmpi sge, %0, %1 : vector<8x128xi32>
    %c96_i32 = arith.constant 96 : i32
    %3 = vector.broadcast %c96_i32 : i32 to vector<8x128xi32>
    %4 = arith.cmpi slt, %0, %3 : vector<8x128xi32>
    %5 = arith.andi %2, %4 : vector<8x128xi1>
    %c0 = arith.constant 0 : index
    %c0_0 = arith.constant 0 : index
    %6 = vector.load %arg0[%c0, %c0_0] : memref<64x7xf32, #tpu.memory_space<vmem>>, vector<64x7xf32>
    %c0_1 = arith.constant 0 : index
    %c0_2 = arith.constant 0 : index
    %7 = vector.load %arg1[%c0_1, %c0_2] : memref<7x128xf32, #tpu.memory_space<vmem>>, vector<7x128xf32>
    %cst = arith.constant dense<0.000000e+00> : vector<64x128xf32>
    %8 = tpu.matmul %6, %7, %cst {dimension_numbers = #tpu.dot_dimension_numbers<[1], [0], [0], [1], [0, 0, 1, 1], [], []>} : vector<64x7xf32>, vector<7x128xf32>, vector<64x128xf32> -> vector<64x128xf32>
    %c0_3 = arith.constant 0 : index
    %c0_4 = arith.constant 0 : index
    %9 = vector.load %arg3[%c0_3, %c0_4] : memref<1x128xf32, #tpu.memory_space<vmem>>, vector<1x128xf32>
    %10 = vector.broadcast %9 : vector<1x128xf32> to vector<64x128xf32>
    %11 = arith.addf %8, %10 : vector<64x128xf32>
    %c0_5 = arith.constant 0 : index
    %c0_6 = arith.constant 0 : index
    %12 = vector.load %arg2[%c0_5, %c0_6] : memref<32x128xf32, #tpu.memory_space<vmem>>, vector<32x128xf32>
    %13 = vector.extract_strided_slice %11 {offsets = [0, 0], sizes = [8, 128], strides = [1, 1]} : vector<64x128xf32> to vector<8x128xf32>
    %14 = vector.extract_strided_slice %11 {offsets = [8, 0], sizes = [8, 128], strides = [1, 1]} : vector<64x128xf32> to vector<8x128xf32>
    %15 = vector.extract_strided_slice %11 {offsets = [16, 0], sizes = [8, 128], strides = [1, 1]} : vector<64x128xf32> to vector<8x128xf32>
    %16 = vector.extract_strided_slice %11 {offsets = [24, 0], sizes = [8, 128], strides = [1, 1]} : vector<64x128xf32> to vector<8x128xf32>
    %17 = vector.extract_strided_slice %11 {offsets = [32, 0], sizes = [8, 128], strides = [1, 1]} : vector<64x128xf32> to vector<8x128xf32>
    %18 = vector.extract_strided_slice %11 {offsets = [40, 0], sizes = [8, 128], strides = [1, 1]} : vector<64x128xf32> to vector<8x128xf32>
    %19 = vector.extract_strided_slice %11 {offsets = [48, 0], sizes = [8, 128], strides = [1, 1]} : vector<64x128xf32> to vector<8x128xf32>
    %20 = vector.extract_strided_slice %11 {offsets = [56, 0], sizes = [8, 128], strides = [1, 1]} : vector<64x128xf32> to vector<8x128xf32>
    %cst_7 = arith.constant 0.000000e+00 : f32
    %21 = vector.broadcast %cst_7 : f32 to vector<8x32xf32>
    %cst_8 = arith.constant 0.000000e+00 : f32
    %22 = vector.broadcast %cst_8 : f32 to vector<8x32xf32>
    %cst_9 = arith.constant dense<0.000000e+00> : vector<8x128xf32>
    %23 = tpu.matmul %21, %12, %cst_9 {dimension_numbers = #tpu.dot_dimension_numbers<[1], [0], [0], [1], [0, 0, 1, 1], [], []>} : vector<8x32xf32>, vector<32x128xf32>, vector<8x128xf32> -> vector<8x128xf32>
    %24 = arith.addf %13, %23 : vector<8x128xf32>
    %25 = arith.addf %24, %24 : vector<8x128xf32>
    %26 = arith.select %5, %25, %24 : vector<8x128xi1>, vector<8x128xf32>
    %27 = arith.negf %26 : vector<8x128xf32>
    %28 = math.exp %27 : vector<8x128xf32>
    %cst_10 = arith.constant 1.000000e+00 : f32
    %29 = vector.broadcast %cst_10 : f32 to vector<8x128xf32>
    %30 = arith.addf %29, %28 : vector<8x128xf32>
    %31 = arith.divf %29, %30 : vector<8x128xf32>
    %32 = arith.addf %31, %31 : vector<8x128xf32>
    %cst_11 = arith.constant 1.000000e+00 : f32
    %33 = vector.broadcast %cst_11 : f32 to vector<8x128xf32>
    %34 = arith.subf %32, %33 : vector<8x128xf32>
    %35 = arith.select %5, %34, %31 : vector<8x128xi1>, vector<8x128xf32>
    %36 = vector.extract_strided_slice %35 {offsets = [0, 0], sizes = [8, 32], strides = [1, 1]} : vector<8x128xf32> to vector<8x32xf32>
    %37 = vector.extract_strided_slice %35 {offsets = [0, 32], sizes = [8, 32], strides = [1, 1]} : vector<8x128xf32> to vector<8x32xf32>
    %38 = vector.extract_strided_slice %35 {offsets = [0, 64], sizes = [8, 32], strides = [1, 1]} : vector<8x128xf32> to vector<8x32xf32>
    %39 = vector.extract_strided_slice %35 {offsets = [0, 96], sizes = [8, 32], strides = [1, 1]} : vector<8x128xf32> to vector<8x32xf32>
    %40 = arith.mulf %37, %22 : vector<8x32xf32>
    %41 = arith.mulf %36, %38 : vector<8x32xf32>
    %42 = arith.addf %40, %41 : vector<8x32xf32>
    %43 = math.tanh %42 : vector<8x32xf32>
    %44 = arith.mulf %39, %43 : vector<8x32xf32>
    %cst_12 = arith.constant dense<0.000000e+00> : vector<8x128xf32>
    %45 = tpu.matmul %44, %12, %cst_12 {dimension_numbers = #tpu.dot_dimension_numbers<[1], [0], [0], [1], [0, 0, 1, 1], [], []>} : vector<8x32xf32>, vector<32x128xf32>, vector<8x128xf32> -> vector<8x128xf32>
    %46 = arith.addf %14, %45 : vector<8x128xf32>
    %47 = arith.addf %46, %46 : vector<8x128xf32>
    %48 = arith.select %5, %47, %46 : vector<8x128xi1>, vector<8x128xf32>
    %49 = arith.negf %48 : vector<8x128xf32>
    %50 = math.exp %49 : vector<8x128xf32>
    %cst_13 = arith.constant 1.000000e+00 : f32
    %51 = vector.broadcast %cst_13 : f32 to vector<8x128xf32>
    %52 = arith.addf %51, %50 : vector<8x128xf32>
    %53 = arith.divf %51, %52 : vector<8x128xf32>
    %54 = arith.addf %53, %53 : vector<8x128xf32>
    %cst_14 = arith.constant 1.000000e+00 : f32
    %55 = vector.broadcast %cst_14 : f32 to vector<8x128xf32>
    %56 = arith.subf %54, %55 : vector<8x128xf32>
    %57 = arith.select %5, %56, %53 : vector<8x128xi1>, vector<8x128xf32>
    %58 = vector.extract_strided_slice %57 {offsets = [0, 0], sizes = [8, 32], strides = [1, 1]} : vector<8x128xf32> to vector<8x32xf32>
    %59 = vector.extract_strided_slice %57 {offsets = [0, 32], sizes = [8, 32], strides = [1, 1]} : vector<8x128xf32> to vector<8x32xf32>
    %60 = vector.extract_strided_slice %57 {offsets = [0, 64], sizes = [8, 32], strides = [1, 1]} : vector<8x128xf32> to vector<8x32xf32>
    %61 = vector.extract_strided_slice %57 {offsets = [0, 96], sizes = [8, 32], strides = [1, 1]} : vector<8x128xf32> to vector<8x32xf32>
    %62 = arith.mulf %59, %42 : vector<8x32xf32>
    %63 = arith.mulf %58, %60 : vector<8x32xf32>
    %64 = arith.addf %62, %63 : vector<8x32xf32>
    %65 = math.tanh %64 : vector<8x32xf32>
    %66 = arith.mulf %61, %65 : vector<8x32xf32>
    %cst_15 = arith.constant dense<0.000000e+00> : vector<8x128xf32>
    %67 = tpu.matmul %66, %12, %cst_15 {dimension_numbers = #tpu.dot_dimension_numbers<[1], [0], [0], [1], [0, 0, 1, 1], [], []>} : vector<8x32xf32>, vector<32x128xf32>, vector<8x128xf32> -> vector<8x128xf32>
    %68 = arith.addf %15, %67 : vector<8x128xf32>
    %69 = arith.addf %68, %68 : vector<8x128xf32>
    %70 = arith.select %5, %69, %68 : vector<8x128xi1>, vector<8x128xf32>
    %71 = arith.negf %70 : vector<8x128xf32>
    %72 = math.exp %71 : vector<8x128xf32>
    %cst_16 = arith.constant 1.000000e+00 : f32
    %73 = vector.broadcast %cst_16 : f32 to vector<8x128xf32>
    %74 = arith.addf %73, %72 : vector<8x128xf32>
    %75 = arith.divf %73, %74 : vector<8x128xf32>
    %76 = arith.addf %75, %75 : vector<8x128xf32>
    %cst_17 = arith.constant 1.000000e+00 : f32
    %77 = vector.broadcast %cst_17 : f32 to vector<8x128xf32>
    %78 = arith.subf %76, %77 : vector<8x128xf32>
    %79 = arith.select %5, %78, %75 : vector<8x128xi1>, vector<8x128xf32>
    %80 = vector.extract_strided_slice %79 {offsets = [0, 0], sizes = [8, 32], strides = [1, 1]} : vector<8x128xf32> to vector<8x32xf32>
    %81 = vector.extract_strided_slice %79 {offsets = [0, 32], sizes = [8, 32], strides = [1, 1]} : vector<8x128xf32> to vector<8x32xf32>
    %82 = vector.extract_strided_slice %79 {offsets = [0, 64], sizes = [8, 32], strides = [1, 1]} : vector<8x128xf32> to vector<8x32xf32>
    %83 = vector.extract_strided_slice %79 {offsets = [0, 96], sizes = [8, 32], strides = [1, 1]} : vector<8x128xf32> to vector<8x32xf32>
    %84 = arith.mulf %81, %64 : vector<8x32xf32>
    %85 = arith.mulf %80, %82 : vector<8x32xf32>
    %86 = arith.addf %84, %85 : vector<8x32xf32>
    %87 = math.tanh %86 : vector<8x32xf32>
    %88 = arith.mulf %83, %87 : vector<8x32xf32>
    %cst_18 = arith.constant dense<0.000000e+00> : vector<8x128xf32>
    %89 = tpu.matmul %88, %12, %cst_18 {dimension_numbers = #tpu.dot_dimension_numbers<[1], [0], [0], [1], [0, 0, 1, 1], [], []>} : vector<8x32xf32>, vector<32x128xf32>, vector<8x128xf32> -> vector<8x128xf32>
    %90 = arith.addf %16, %89 : vector<8x128xf32>
    %91 = arith.addf %90, %90 : vector<8x128xf32>
    %92 = arith.select %5, %91, %90 : vector<8x128xi1>, vector<8x128xf32>
    %93 = arith.negf %92 : vector<8x128xf32>
    %94 = math.exp %93 : vector<8x128xf32>
    %cst_19 = arith.constant 1.000000e+00 : f32
    %95 = vector.broadcast %cst_19 : f32 to vector<8x128xf32>
    %96 = arith.addf %95, %94 : vector<8x128xf32>
    %97 = arith.divf %95, %96 : vector<8x128xf32>
    %98 = arith.addf %97, %97 : vector<8x128xf32>
    %cst_20 = arith.constant 1.000000e+00 : f32
    %99 = vector.broadcast %cst_20 : f32 to vector<8x128xf32>
    %100 = arith.subf %98, %99 : vector<8x128xf32>
    %101 = arith.select %5, %100, %97 : vector<8x128xi1>, vector<8x128xf32>
    %102 = vector.extract_strided_slice %101 {offsets = [0, 0], sizes = [8, 32], strides = [1, 1]} : vector<8x128xf32> to vector<8x32xf32>
    %103 = vector.extract_strided_slice %101 {offsets = [0, 32], sizes = [8, 32], strides = [1, 1]} : vector<8x128xf32> to vector<8x32xf32>
    %104 = vector.extract_strided_slice %101 {offsets = [0, 64], sizes = [8, 32], strides = [1, 1]} : vector<8x128xf32> to vector<8x32xf32>
    %105 = vector.extract_strided_slice %101 {offsets = [0, 96], sizes = [8, 32], strides = [1, 1]} : vector<8x128xf32> to vector<8x32xf32>
    %106 = arith.mulf %103, %86 : vector<8x32xf32>
    %107 = arith.mulf %102, %104 : vector<8x32xf32>
    %108 = arith.addf %106, %107 : vector<8x32xf32>
    %109 = math.tanh %108 : vector<8x32xf32>
    %110 = arith.mulf %105, %109 : vector<8x32xf32>
    %cst_21 = arith.constant dense<0.000000e+00> : vector<8x128xf32>
    %111 = tpu.matmul %110, %12, %cst_21 {dimension_numbers = #tpu.dot_dimension_numbers<[1], [0], [0], [1], [0, 0, 1, 1], [], []>} : vector<8x32xf32>, vector<32x128xf32>, vector<8x128xf32> -> vector<8x128xf32>
    %112 = arith.addf %17, %111 : vector<8x128xf32>
    %113 = arith.addf %112, %112 : vector<8x128xf32>
    %114 = arith.select %5, %113, %112 : vector<8x128xi1>, vector<8x128xf32>
    %115 = arith.negf %114 : vector<8x128xf32>
    %116 = math.exp %115 : vector<8x128xf32>
    %cst_22 = arith.constant 1.000000e+00 : f32
    %117 = vector.broadcast %cst_22 : f32 to vector<8x128xf32>
    %118 = arith.addf %117, %116 : vector<8x128xf32>
    %119 = arith.divf %117, %118 : vector<8x128xf32>
    %120 = arith.addf %119, %119 : vector<8x128xf32>
    %cst_23 = arith.constant 1.000000e+00 : f32
    %121 = vector.broadcast %cst_23 : f32 to vector<8x128xf32>
    %122 = arith.subf %120, %121 : vector<8x128xf32>
    %123 = arith.select %5, %122, %119 : vector<8x128xi1>, vector<8x128xf32>
    %124 = vector.extract_strided_slice %123 {offsets = [0, 0], sizes = [8, 32], strides = [1, 1]} : vector<8x128xf32> to vector<8x32xf32>
    %125 = vector.extract_strided_slice %123 {offsets = [0, 32], sizes = [8, 32], strides = [1, 1]} : vector<8x128xf32> to vector<8x32xf32>
    %126 = vector.extract_strided_slice %123 {offsets = [0, 64], sizes = [8, 32], strides = [1, 1]} : vector<8x128xf32> to vector<8x32xf32>
    %127 = vector.extract_strided_slice %123 {offsets = [0, 96], sizes = [8, 32], strides = [1, 1]} : vector<8x128xf32> to vector<8x32xf32>
    %128 = arith.mulf %125, %108 : vector<8x32xf32>
    %129 = arith.mulf %124, %126 : vector<8x32xf32>
    %130 = arith.addf %128, %129 : vector<8x32xf32>
    %131 = math.tanh %130 : vector<8x32xf32>
    %132 = arith.mulf %127, %131 : vector<8x32xf32>
    %cst_24 = arith.constant dense<0.000000e+00> : vector<8x128xf32>
    %133 = tpu.matmul %132, %12, %cst_24 {dimension_numbers = #tpu.dot_dimension_numbers<[1], [0], [0], [1], [0, 0, 1, 1], [], []>} : vector<8x32xf32>, vector<32x128xf32>, vector<8x128xf32> -> vector<8x128xf32>
    %134 = arith.addf %18, %133 : vector<8x128xf32>
    %135 = arith.addf %134, %134 : vector<8x128xf32>
    %136 = arith.select %5, %135, %134 : vector<8x128xi1>, vector<8x128xf32>
    %137 = arith.negf %136 : vector<8x128xf32>
    %138 = math.exp %137 : vector<8x128xf32>
    %cst_25 = arith.constant 1.000000e+00 : f32
    %139 = vector.broadcast %cst_25 : f32 to vector<8x128xf32>
    %140 = arith.addf %139, %138 : vector<8x128xf32>
    %141 = arith.divf %139, %140 : vector<8x128xf32>
    %142 = arith.addf %141, %141 : vector<8x128xf32>
    %cst_26 = arith.constant 1.000000e+00 : f32
    %143 = vector.broadcast %cst_26 : f32 to vector<8x128xf32>
    %144 = arith.subf %142, %143 : vector<8x128xf32>
    %145 = arith.select %5, %144, %141 : vector<8x128xi1>, vector<8x128xf32>
    %146 = vector.extract_strided_slice %145 {offsets = [0, 0], sizes = [8, 32], strides = [1, 1]} : vector<8x128xf32> to vector<8x32xf32>
    %147 = vector.extract_strided_slice %145 {offsets = [0, 32], sizes = [8, 32], strides = [1, 1]} : vector<8x128xf32> to vector<8x32xf32>
    %148 = vector.extract_strided_slice %145 {offsets = [0, 64], sizes = [8, 32], strides = [1, 1]} : vector<8x128xf32> to vector<8x32xf32>
    %149 = vector.extract_strided_slice %145 {offsets = [0, 96], sizes = [8, 32], strides = [1, 1]} : vector<8x128xf32> to vector<8x32xf32>
    %150 = arith.mulf %147, %130 : vector<8x32xf32>
    %151 = arith.mulf %146, %148 : vector<8x32xf32>
    %152 = arith.addf %150, %151 : vector<8x32xf32>
    %153 = math.tanh %152 : vector<8x32xf32>
    %154 = arith.mulf %149, %153 : vector<8x32xf32>
    %cst_27 = arith.constant dense<0.000000e+00> : vector<8x128xf32>
    %155 = tpu.matmul %154, %12, %cst_27 {dimension_numbers = #tpu.dot_dimension_numbers<[1], [0], [0], [1], [0, 0, 1, 1], [], []>} : vector<8x32xf32>, vector<32x128xf32>, vector<8x128xf32> -> vector<8x128xf32>
    %156 = arith.addf %19, %155 : vector<8x128xf32>
    %157 = arith.addf %156, %156 : vector<8x128xf32>
    %158 = arith.select %5, %157, %156 : vector<8x128xi1>, vector<8x128xf32>
    %159 = arith.negf %158 : vector<8x128xf32>
    %160 = math.exp %159 : vector<8x128xf32>
    %cst_28 = arith.constant 1.000000e+00 : f32
    %161 = vector.broadcast %cst_28 : f32 to vector<8x128xf32>
    %162 = arith.addf %161, %160 : vector<8x128xf32>
    %163 = arith.divf %161, %162 : vector<8x128xf32>
    %164 = arith.addf %163, %163 : vector<8x128xf32>
    %cst_29 = arith.constant 1.000000e+00 : f32
    %165 = vector.broadcast %cst_29 : f32 to vector<8x128xf32>
    %166 = arith.subf %164, %165 : vector<8x128xf32>
    %167 = arith.select %5, %166, %163 : vector<8x128xi1>, vector<8x128xf32>
    %168 = vector.extract_strided_slice %167 {offsets = [0, 0], sizes = [8, 32], strides = [1, 1]} : vector<8x128xf32> to vector<8x32xf32>
    %169 = vector.extract_strided_slice %167 {offsets = [0, 32], sizes = [8, 32], strides = [1, 1]} : vector<8x128xf32> to vector<8x32xf32>
    %170 = vector.extract_strided_slice %167 {offsets = [0, 64], sizes = [8, 32], strides = [1, 1]} : vector<8x128xf32> to vector<8x32xf32>
    %171 = vector.extract_strided_slice %167 {offsets = [0, 96], sizes = [8, 32], strides = [1, 1]} : vector<8x128xf32> to vector<8x32xf32>
    %172 = arith.mulf %169, %152 : vector<8x32xf32>
    %173 = arith.mulf %168, %170 : vector<8x32xf32>
    %174 = arith.addf %172, %173 : vector<8x32xf32>
    %175 = math.tanh %174 : vector<8x32xf32>
    %176 = arith.mulf %171, %175 : vector<8x32xf32>
    %cst_30 = arith.constant dense<0.000000e+00> : vector<8x128xf32>
    %177 = tpu.matmul %176, %12, %cst_30 {dimension_numbers = #tpu.dot_dimension_numbers<[1], [0], [0], [1], [0, 0, 1, 1], [], []>} : vector<8x32xf32>, vector<32x128xf32>, vector<8x128xf32> -> vector<8x128xf32>
    %178 = arith.addf %20, %177 : vector<8x128xf32>
    %179 = arith.addf %178, %178 : vector<8x128xf32>
    %180 = arith.select %5, %179, %178 : vector<8x128xi1>, vector<8x128xf32>
    %181 = arith.negf %180 : vector<8x128xf32>
    %182 = math.exp %181 : vector<8x128xf32>
    %cst_31 = arith.constant 1.000000e+00 : f32
    %183 = vector.broadcast %cst_31 : f32 to vector<8x128xf32>
    %184 = arith.addf %183, %182 : vector<8x128xf32>
    %185 = arith.divf %183, %184 : vector<8x128xf32>
    %186 = arith.addf %185, %185 : vector<8x128xf32>
    %cst_32 = arith.constant 1.000000e+00 : f32
    %187 = vector.broadcast %cst_32 : f32 to vector<8x128xf32>
    %188 = arith.subf %186, %187 : vector<8x128xf32>
    %189 = arith.select %5, %188, %185 : vector<8x128xi1>, vector<8x128xf32>
    %190 = vector.extract_strided_slice %189 {offsets = [0, 0], sizes = [8, 32], strides = [1, 1]} : vector<8x128xf32> to vector<8x32xf32>
    %191 = vector.extract_strided_slice %189 {offsets = [0, 32], sizes = [8, 32], strides = [1, 1]} : vector<8x128xf32> to vector<8x32xf32>
    %192 = vector.extract_strided_slice %189 {offsets = [0, 64], sizes = [8, 32], strides = [1, 1]} : vector<8x128xf32> to vector<8x32xf32>
    %193 = vector.extract_strided_slice %189 {offsets = [0, 96], sizes = [8, 32], strides = [1, 1]} : vector<8x128xf32> to vector<8x32xf32>
    %194 = arith.mulf %191, %174 : vector<8x32xf32>
    %195 = arith.mulf %190, %192 : vector<8x32xf32>
    %196 = arith.addf %194, %195 : vector<8x32xf32>
    %197 = math.tanh %196 : vector<8x32xf32>
    %198 = arith.mulf %193, %197 : vector<8x32xf32>
    %c0_33 = arith.constant 0 : index
    %c0_34 = arith.constant 0 : index
    %199 = vector.load %arg4[%c0_33, %c0_34] : memref<32x128xf32, #tpu.memory_space<vmem>>, vector<32x128xf32>
    %c0_35 = arith.constant 0 : index
    %c0_36 = arith.constant 0 : index
    %200 = vector.load %arg5[%c0_35, %c0_36] : memref<1x128xf32, #tpu.memory_space<vmem>>, vector<1x128xf32>
    %c0_37 = arith.constant 0 : index
    %c0_38 = arith.constant 0 : index
    %201 = vector.load %arg6[%c0_37, %c0_38] : memref<32x128xf32, #tpu.memory_space<vmem>>, vector<32x128xf32>
    %c0_39 = arith.constant 0 : index
    %c0_40 = arith.constant 0 : index
    %202 = vector.load %arg7[%c0_39, %c0_40] : memref<1x128xf32, #tpu.memory_space<vmem>>, vector<1x128xf32>
    %cst_41 = arith.constant dense<0.000000e+00> : vector<8x128xf32>
    %203 = tpu.matmul %198, %199, %cst_41 {dimension_numbers = #tpu.dot_dimension_numbers<[1], [0], [0], [1], [0, 0, 1, 1], [], []>} : vector<8x32xf32>, vector<32x128xf32>, vector<8x128xf32> -> vector<8x128xf32>
    %204 = vector.broadcast %200 : vector<1x128xf32> to vector<8x128xf32>
    %205 = arith.addf %203, %204 : vector<8x128xf32>
    %206 = arith.addf %205, %205 : vector<8x128xf32>
    %207 = arith.select %5, %206, %205 : vector<8x128xi1>, vector<8x128xf32>
    %208 = arith.negf %207 : vector<8x128xf32>
    %209 = math.exp %208 : vector<8x128xf32>
    %cst_42 = arith.constant 1.000000e+00 : f32
    %210 = vector.broadcast %cst_42 : f32 to vector<8x128xf32>
    %211 = arith.addf %210, %209 : vector<8x128xf32>
    %212 = arith.divf %210, %211 : vector<8x128xf32>
    %213 = arith.addf %212, %212 : vector<8x128xf32>
    %cst_43 = arith.constant 1.000000e+00 : f32
    %214 = vector.broadcast %cst_43 : f32 to vector<8x128xf32>
    %215 = arith.subf %213, %214 : vector<8x128xf32>
    %216 = arith.select %5, %215, %212 : vector<8x128xi1>, vector<8x128xf32>
    %217 = vector.extract_strided_slice %216 {offsets = [0, 0], sizes = [8, 32], strides = [1, 1]} : vector<8x128xf32> to vector<8x32xf32>
    %218 = vector.extract_strided_slice %216 {offsets = [0, 32], sizes = [8, 32], strides = [1, 1]} : vector<8x128xf32> to vector<8x32xf32>
    %219 = vector.extract_strided_slice %216 {offsets = [0, 64], sizes = [8, 32], strides = [1, 1]} : vector<8x128xf32> to vector<8x32xf32>
    %220 = vector.extract_strided_slice %216 {offsets = [0, 96], sizes = [8, 32], strides = [1, 1]} : vector<8x128xf32> to vector<8x32xf32>
    %221 = arith.mulf %218, %196 : vector<8x32xf32>
    %222 = arith.mulf %217, %219 : vector<8x32xf32>
    %223 = arith.addf %221, %222 : vector<8x32xf32>
    %224 = math.tanh %223 : vector<8x32xf32>
    %225 = arith.mulf %220, %224 : vector<8x32xf32>
    %cst_44 = arith.constant dense<0.000000e+00> : vector<8x128xf32>
    %226 = tpu.matmul %225, %201, %cst_44 {dimension_numbers = #tpu.dot_dimension_numbers<[1], [0], [0], [1], [0, 0, 1, 1], [], []>} : vector<8x32xf32>, vector<32x128xf32>, vector<8x128xf32> -> vector<8x128xf32>
    %227 = vector.broadcast %202 : vector<1x128xf32> to vector<8x128xf32>
    %228 = arith.addf %226, %227 : vector<8x128xf32>
    %229 = arith.addf %228, %228 : vector<8x128xf32>
    %230 = arith.select %5, %229, %228 : vector<8x128xi1>, vector<8x128xf32>
    %231 = arith.negf %230 : vector<8x128xf32>
    %232 = math.exp %231 : vector<8x128xf32>
    %cst_45 = arith.constant 1.000000e+00 : f32
    %233 = vector.broadcast %cst_45 : f32 to vector<8x128xf32>
    %234 = arith.addf %233, %232 : vector<8x128xf32>
    %235 = arith.divf %233, %234 : vector<8x128xf32>
    %236 = arith.addf %235, %235 : vector<8x128xf32>
    %cst_46 = arith.constant 1.000000e+00 : f32
    %237 = vector.broadcast %cst_46 : f32 to vector<8x128xf32>
    %238 = arith.subf %236, %237 : vector<8x128xf32>
    %239 = arith.select %5, %238, %235 : vector<8x128xi1>, vector<8x128xf32>
    %240 = vector.extract_strided_slice %239 {offsets = [0, 0], sizes = [8, 32], strides = [1, 1]} : vector<8x128xf32> to vector<8x32xf32>
    %241 = vector.extract_strided_slice %239 {offsets = [0, 32], sizes = [8, 32], strides = [1, 1]} : vector<8x128xf32> to vector<8x32xf32>
    %242 = vector.extract_strided_slice %239 {offsets = [0, 64], sizes = [8, 32], strides = [1, 1]} : vector<8x128xf32> to vector<8x32xf32>
    %243 = vector.extract_strided_slice %239 {offsets = [0, 96], sizes = [8, 32], strides = [1, 1]} : vector<8x128xf32> to vector<8x32xf32>
    %244 = arith.mulf %241, %223 : vector<8x32xf32>
    %245 = arith.mulf %240, %242 : vector<8x32xf32>
    %246 = arith.addf %244, %245 : vector<8x32xf32>
    %247 = math.tanh %246 : vector<8x32xf32>
    %248 = arith.mulf %243, %247 : vector<8x32xf32>
    %cst_47 = arith.constant dense<0.000000e+00> : vector<8x128xf32>
    %249 = tpu.matmul %248, %201, %cst_47 {dimension_numbers = #tpu.dot_dimension_numbers<[1], [0], [0], [1], [0, 0, 1, 1], [], []>} : vector<8x32xf32>, vector<32x128xf32>, vector<8x128xf32> -> vector<8x128xf32>
    %250 = vector.broadcast %202 : vector<1x128xf32> to vector<8x128xf32>
    %251 = arith.addf %249, %250 : vector<8x128xf32>
    %252 = arith.addf %251, %251 : vector<8x128xf32>
    %253 = arith.select %5, %252, %251 : vector<8x128xi1>, vector<8x128xf32>
    %254 = arith.negf %253 : vector<8x128xf32>
    %255 = math.exp %254 : vector<8x128xf32>
    %cst_48 = arith.constant 1.000000e+00 : f32
    %256 = vector.broadcast %cst_48 : f32 to vector<8x128xf32>
    %257 = arith.addf %256, %255 : vector<8x128xf32>
    %258 = arith.divf %256, %257 : vector<8x128xf32>
    %259 = arith.addf %258, %258 : vector<8x128xf32>
    %cst_49 = arith.constant 1.000000e+00 : f32
    %260 = vector.broadcast %cst_49 : f32 to vector<8x128xf32>
    %261 = arith.subf %259, %260 : vector<8x128xf32>
    %262 = arith.select %5, %261, %258 : vector<8x128xi1>, vector<8x128xf32>
    %263 = vector.extract_strided_slice %262 {offsets = [0, 0], sizes = [8, 32], strides = [1, 1]} : vector<8x128xf32> to vector<8x32xf32>
    %264 = vector.extract_strided_slice %262 {offsets = [0, 32], sizes = [8, 32], strides = [1, 1]} : vector<8x128xf32> to vector<8x32xf32>
    %265 = vector.extract_strided_slice %262 {offsets = [0, 64], sizes = [8, 32], strides = [1, 1]} : vector<8x128xf32> to vector<8x32xf32>
    %266 = vector.extract_strided_slice %262 {offsets = [0, 96], sizes = [8, 32], strides = [1, 1]} : vector<8x128xf32> to vector<8x32xf32>
    %267 = arith.mulf %264, %246 : vector<8x32xf32>
    %268 = arith.mulf %263, %265 : vector<8x32xf32>
    %269 = arith.addf %267, %268 : vector<8x32xf32>
    %270 = math.tanh %269 : vector<8x32xf32>
    %271 = arith.mulf %266, %270 : vector<8x32xf32>
    %cst_50 = arith.constant dense<0.000000e+00> : vector<8x128xf32>
    %272 = tpu.matmul %271, %201, %cst_50 {dimension_numbers = #tpu.dot_dimension_numbers<[1], [0], [0], [1], [0, 0, 1, 1], [], []>} : vector<8x32xf32>, vector<32x128xf32>, vector<8x128xf32> -> vector<8x128xf32>
    %273 = vector.broadcast %202 : vector<1x128xf32> to vector<8x128xf32>
    %274 = arith.addf %272, %273 : vector<8x128xf32>
    %275 = arith.addf %274, %274 : vector<8x128xf32>
    %276 = arith.select %5, %275, %274 : vector<8x128xi1>, vector<8x128xf32>
    %277 = arith.negf %276 : vector<8x128xf32>
    %278 = math.exp %277 : vector<8x128xf32>
    %cst_51 = arith.constant 1.000000e+00 : f32
    %279 = vector.broadcast %cst_51 : f32 to vector<8x128xf32>
    %280 = arith.addf %279, %278 : vector<8x128xf32>
    %281 = arith.divf %279, %280 : vector<8x128xf32>
    %282 = arith.addf %281, %281 : vector<8x128xf32>
    %cst_52 = arith.constant 1.000000e+00 : f32
    %283 = vector.broadcast %cst_52 : f32 to vector<8x128xf32>
    %284 = arith.subf %282, %283 : vector<8x128xf32>
    %285 = arith.select %5, %284, %281 : vector<8x128xi1>, vector<8x128xf32>
    %286 = vector.extract_strided_slice %285 {offsets = [0, 0], sizes = [8, 32], strides = [1, 1]} : vector<8x128xf32> to vector<8x32xf32>
    %287 = vector.extract_strided_slice %285 {offsets = [0, 32], sizes = [8, 32], strides = [1, 1]} : vector<8x128xf32> to vector<8x32xf32>
    %288 = vector.extract_strided_slice %285 {offsets = [0, 64], sizes = [8, 32], strides = [1, 1]} : vector<8x128xf32> to vector<8x32xf32>
    %289 = vector.extract_strided_slice %285 {offsets = [0, 96], sizes = [8, 32], strides = [1, 1]} : vector<8x128xf32> to vector<8x32xf32>
    %290 = arith.mulf %287, %269 : vector<8x32xf32>
    %291 = arith.mulf %286, %288 : vector<8x32xf32>
    %292 = arith.addf %290, %291 : vector<8x32xf32>
    %293 = math.tanh %292 : vector<8x32xf32>
    %294 = arith.mulf %289, %293 : vector<8x32xf32>
    %cst_53 = arith.constant dense<0.000000e+00> : vector<8x128xf32>
    %295 = tpu.matmul %294, %201, %cst_53 {dimension_numbers = #tpu.dot_dimension_numbers<[1], [0], [0], [1], [0, 0, 1, 1], [], []>} : vector<8x32xf32>, vector<32x128xf32>, vector<8x128xf32> -> vector<8x128xf32>
    %296 = vector.broadcast %202 : vector<1x128xf32> to vector<8x128xf32>
    %297 = arith.addf %295, %296 : vector<8x128xf32>
    %298 = arith.addf %297, %297 : vector<8x128xf32>
    %299 = arith.select %5, %298, %297 : vector<8x128xi1>, vector<8x128xf32>
    %300 = arith.negf %299 : vector<8x128xf32>
    %301 = math.exp %300 : vector<8x128xf32>
    %cst_54 = arith.constant 1.000000e+00 : f32
    %302 = vector.broadcast %cst_54 : f32 to vector<8x128xf32>
    %303 = arith.addf %302, %301 : vector<8x128xf32>
    %304 = arith.divf %302, %303 : vector<8x128xf32>
    %305 = arith.addf %304, %304 : vector<8x128xf32>
    %cst_55 = arith.constant 1.000000e+00 : f32
    %306 = vector.broadcast %cst_55 : f32 to vector<8x128xf32>
    %307 = arith.subf %305, %306 : vector<8x128xf32>
    %308 = arith.select %5, %307, %304 : vector<8x128xi1>, vector<8x128xf32>
    %309 = vector.extract_strided_slice %308 {offsets = [0, 0], sizes = [8, 32], strides = [1, 1]} : vector<8x128xf32> to vector<8x32xf32>
    %310 = vector.extract_strided_slice %308 {offsets = [0, 32], sizes = [8, 32], strides = [1, 1]} : vector<8x128xf32> to vector<8x32xf32>
    %311 = vector.extract_strided_slice %308 {offsets = [0, 64], sizes = [8, 32], strides = [1, 1]} : vector<8x128xf32> to vector<8x32xf32>
    %312 = vector.extract_strided_slice %308 {offsets = [0, 96], sizes = [8, 32], strides = [1, 1]} : vector<8x128xf32> to vector<8x32xf32>
    %313 = arith.mulf %310, %292 : vector<8x32xf32>
    %314 = arith.mulf %309, %311 : vector<8x32xf32>
    %315 = arith.addf %313, %314 : vector<8x32xf32>
    %316 = math.tanh %315 : vector<8x32xf32>
    %317 = arith.mulf %312, %316 : vector<8x32xf32>
    %c0_56 = arith.constant 0 : index
    %c0_57 = arith.constant 0 : index
    %318 = vector.load %arg8[%c0_56, %c0_57] : memref<1x32xf32, #tpu.memory_space<vmem>>, vector<1x32xf32>
    %c0_58 = arith.constant 0 : index
    %c0_59 = arith.constant 0 : index
    %319 = vector.load %arg9[%c0_58, %c0_59] : memref<1x1xf32, #tpu.memory_space<vmem>>, vector<1x1xf32>
    %320 = vector.broadcast %318 : vector<1x32xf32> to vector<8x32xf32>
    %321 = arith.mulf %225, %320 : vector<8x32xf32>
    %cst_60 = arith.constant dense<0.000000e+00> : vector<8xf32>
    %322 = vector.multi_reduction <add>, %321, %cst_60 [1] : vector<8x32xf32> to vector<8xf32>
    %323 = vector.shape_cast %322 : vector<8xf32> to vector<8x1xf32>
    %324 = vector.broadcast %319 : vector<1x1xf32> to vector<8x1xf32>
    %325 = arith.addf %323, %324 : vector<8x1xf32>
    %326 = vector.broadcast %318 : vector<1x32xf32> to vector<8x32xf32>
    %327 = arith.mulf %248, %326 : vector<8x32xf32>
    %cst_61 = arith.constant dense<0.000000e+00> : vector<8xf32>
    %328 = vector.multi_reduction <add>, %327, %cst_61 [1] : vector<8x32xf32> to vector<8xf32>
    %329 = vector.shape_cast %328 : vector<8xf32> to vector<8x1xf32>
    %330 = vector.broadcast %319 : vector<1x1xf32> to vector<8x1xf32>
    %331 = arith.addf %329, %330 : vector<8x1xf32>
    %332 = vector.broadcast %318 : vector<1x32xf32> to vector<8x32xf32>
    %333 = arith.mulf %271, %332 : vector<8x32xf32>
    %cst_62 = arith.constant dense<0.000000e+00> : vector<8xf32>
    %334 = vector.multi_reduction <add>, %333, %cst_62 [1] : vector<8x32xf32> to vector<8xf32>
    %335 = vector.shape_cast %334 : vector<8xf32> to vector<8x1xf32>
    %336 = vector.broadcast %319 : vector<1x1xf32> to vector<8x1xf32>
    %337 = arith.addf %335, %336 : vector<8x1xf32>
    %338 = vector.broadcast %318 : vector<1x32xf32> to vector<8x32xf32>
    %339 = arith.mulf %294, %338 : vector<8x32xf32>
    %cst_63 = arith.constant dense<0.000000e+00> : vector<8xf32>
    %340 = vector.multi_reduction <add>, %339, %cst_63 [1] : vector<8x32xf32> to vector<8xf32>
    %341 = vector.shape_cast %340 : vector<8xf32> to vector<8x1xf32>
    %342 = vector.broadcast %319 : vector<1x1xf32> to vector<8x1xf32>
    %343 = arith.addf %341, %342 : vector<8x1xf32>
    %344 = vector.broadcast %318 : vector<1x32xf32> to vector<8x32xf32>
    %345 = arith.mulf %317, %344 : vector<8x32xf32>
    %cst_64 = arith.constant dense<0.000000e+00> : vector<8xf32>
    %346 = vector.multi_reduction <add>, %345, %cst_64 [1] : vector<8x32xf32> to vector<8xf32>
    %347 = vector.shape_cast %346 : vector<8xf32> to vector<8x1xf32>
    %348 = vector.broadcast %319 : vector<1x1xf32> to vector<8x1xf32>
    %349 = arith.addf %347, %348 : vector<8x1xf32>
    %350 = tpu.concatenate %325, %331, %337, %343, %349 in 1 : vector<8x1xf32>, vector<8x1xf32>, vector<8x1xf32>, vector<8x1xf32>, vector<8x1xf32> -> vector<8x5xf32>
    %c0_65 = arith.constant 0 : index
    %c0_66 = arith.constant 0 : index
    %351 = vector.load %arg10[%c0_65, %c0_66] : memref<8x5xf32, #tpu.memory_space<vmem>>, vector<8x5xf32>
    tpu.vector_store %arg10[%c0_65, %c0_66], %350 {strides = array<i32>} : memref<8x5xf32, #tpu.memory_space<vmem>>, vector<8x5xf32>,
    return
  }
}

</mosaic_0001>

<bundles_post_ra>
// kernel: model_preds_forward.1
= control target key start
LH: loop header
LB: loop body
LE: loop exit
PB: predicated region body
PF: predicated region fallthrough
CT: control target
= control target key end

     0   :  { %vm83_vm0 = vcmask 1046528   ;;  %vm58_vm1 = vcmask 56320   ;;  %v2104_v0 = vmov 0.0|0.0   ;;  %vm2105_vm2 = vmmov 0   ;;  %s2108_s27 = smov 32   ;;  %s2109_s16 = smov 96   ;;  %s2502_s2 = inlined_call_operand.vmem [shape: f32[32,128], index: 2, kind: input, shape index: {}]   ;;  %s2503_s1 = inlined_call_operand.vmem [shape: f32[7,128], index: 1, kind: input, shape index: {}]   ;;  %s2504_s0 = inlined_call_operand.vmem [shape: f32[64,7], index: 0, kind: input, shape index: {}]   ;;  %s2505_s3 = inlined_call_operand.vmem [shape: f32[1,128], index: 3, kind: input, shape index: {}]   ;;  %s2506_s4 = inlined_call_operand.vmem [shape: f32[32,128], index: 4, kind: input, shape index: {}]   ;;  %s2507_s5 = inlined_call_operand.vmem [shape: f32[1,128], index: 5, kind: input, shape index: {}]   ;;  %s2508_s6 = inlined_call_operand.vmem [shape: f32[32,128], index: 6, kind: input, shape index: {}]   ;;  %s2509_s7 = inlined_call_operand.vmem [shape: f32[1,128], index: 7, kind: input, shape index: {}]   ;;  %s2510_s8 = inlined_call_operand.vmem [shape: f32[1,32], index: 8, kind: input, shape index: {}]   ;;  %s2511_s9 = inlined_call_operand.<no memory space> [shape: f32[1,1], index: 9, kind: input, shape index: {}]   ;;  %s2512_s10 = inlined_call_operand.vmem [shape: f32[8,5], index: 10, kind: output, shape index: {}]  }
   0x1   :  { %1938 = vmatprep.subr.bf16.mxu1 %v2104_v0  ;;  %v192_v1 = vld [vmem:[%s2502_s2] sm:$0xff]  ;;  %v193_v2 = vld [vmem:[%s2502_s2 + $0x8] sm:$0xff]  ;;  %v194_v7 = vld [vmem:[%s2502_s2 + $0x10] sm:$0xff]  ;;  %v2106_v8 = vmov 0.0   ;;  %v37_v11 = vlaneseq  ;;  %vm196_vm6 = vcmask 261120   ;;  %s2113_s18 = smov 4  }
   0x2   :  { %v50_v3 = vld [vmem:[%s2503_s1] sm:$0x7f]  ;;  %v2179_v4 = vpack.c.bf16 %v193_v2, %v192_v1  ;;  %v43_v6 = vld [vmem:[%s2504_s0 + $0x8] sm:$0xff]  ;;  %1803 = vmatprep.mubr.msk.f32.mxu1 %vm2105_vm2, %v2106_v8  ;;  %v195_v9 = vld [vmem:[%s2502_s2 + $0x18] sm:$0xff]  ;;  %vm1641_vm7 = vcmask 7168   ;;  %vm1643_vm8 = vcmask 15360  }
   0x3   :  { %1781 = vmatprep.subr.msk.mxu0 %vm83_vm0, %v50_v3  ;;  %v42_v5 = vld [vmem:[%s2504_s0] sm:$0xff]  ;;  %v2200_v10 = vpack.c.bf16 %v195_v9, %v194_v7  ;;  %v38_v15 = vand.u32 127, %v37_v11  ;;  %v44_v57 = vld [vmem:[%s2504_s0 + $0x10] sm:$0xff]  ;;  %v45_v58 = vld [vmem:[%s2504_s0 + $0x18] sm:$0xff]  ;;  %vm1645_vm9 = vcmask 23552   ;;  %vm1647_vm10 = vcmask 31744  }
   0x4   :  { %1782 = vmatpush3.msk.msra.mxu0 %vm83_vm0, %v50_v3  ;;  %1783 = vmatprep.mubr.msk.f32.mxu0 %vm58_vm1, %v42_v5  ;;  %v2220_v13 = vld [vmem:[%s2505_s3] ss:$0 sm:$0xff]  ;;  %s2107_s3 = smov 64   ;;  %v47_v60 = vld [vmem:[%s2504_s0 + $0x28] sm:$0xff]  ;;  %v48_v61 = vld [vmem:[%s2504_s0 + $0x30] sm:$0xff]  ;;  %vm1649_vm11 = vcmask 39936  }
   0x5   :  { %1940 = vmatpush3.bf16.msra.mxu1 %v2179_v4  ;;  %1784 = vmatmul.mubr.msk.f32.vlgmr.msra.gmra.mrb[0].mxu0 %vm58_vm1, %v43_v6  ;;  %vm39_vm3 = vcmp.ge.s32.totalorder %v38_v15, 64  ;;  %vm40_vm4 = vcmp.lt.s32.totalorder %v38_v15, 96  ;;  %v46_v59 = vld [vmem:[%s2504_s0 + $0x20] sm:$0xff]  ;;  %v49_v62 = vld [vmem:[%s2504_s0 + $0x38] sm:$0xff] }
   0x6   :  { %1941 = vmatprep.subr.bf16.mxu1 %v2104_v0  ;;  %1950 = vmatprep.subr.bf16.mxu0 %v2104_v0  ;;  %vm2223_vm5 = vmand %vm39_vm3, %vm40_vm4 }
   0x7   :  { %1952 = vmatpush3.bf16.msra.mxu0 %v2179_v4  ;;  %1786 = vmatprep.mubr.msk.f32.mxu0 %vm58_vm1, %v44_v57 }
   0x8   :  { %1953 = vmatprep.subr.bf16.mxu0 %v2104_v0 }
   0x9   :  { %1943 = vmatpush3.bf16.msra.mxu1 %v2200_v10  ;;  %1787 = vmatmul.mubr.msk.f32.gmra.mrb[2].mxu0 %vm58_vm1, %v45_v58 }
   0xa   :  { %1944 = vmatprep.subr.bf16.mxu1 %v2104_v0  ;;  %1789 = vmatprep.mubr.msk.f32.mxu0 %vm58_vm1, %v46_v59 }
   0xb   :  { %1955 = vmatpush3.bf16.msra.mxu0 %v2200_v10 }
   0xc   :  { %1804 = vmatmul.mubr.f32.vlgmr.msra.gmra.mrb[0].mxu1 %v2106_v8  ;;  %1962 = vmatprep.subr.bf16.mxu0 %v2104_v0 }
   0xd   :  { %1946 = vmatpush3.bf16.msra.mxu1 %v2179_v4  ;;  %1814 = vmatprep.mubr.msk.f32.mxu1 %vm2105_vm2, %v2106_v8 }
   0xe   :  { %1947 = vmatprep.subr.bf16.mxu1 %v2104_v0  ;;  %1790 = vmatmul.mubr.msk.f32.gmra.mrb[4].mxu0 %vm58_vm1, %v47_v60 }
   0xf   :  { %1792 = vmatprep.mubr.msk.f32.mxu0 %vm58_vm1, %v48_v61 }
  0x11   :  { %1949 = vmatpush3.bf16.msra.mxu1 %v2200_v10 }
  0x12   :  { %1956 = vmatprep.subr.bf16.mxu1 %v2104_v0  ;;  %1793 = vmatmul.mubr.msk.f32.gmra.mrb[6].mxu0 %vm58_vm1, %v49_v62 }
  0x13   :  { %1825 = vmatprep.mubr.msk.f32.mxu0 %vm2105_vm2, %v2106_v8 }
  0xd8   :  { %v1785_v12 = vpop.f32.mrb[0].mxu0 }
  0xd9   :  { %v153_v14 = vpop.f32.mrb[1].mxu0  ;;  %v159_v39 = vadd.f32 %v1785_v12, %v2220_v13 }
  0xda   :  { %v154_v16 = vadd.f32 %v2220_v13, %v153_v14 }
  0xdc   :  { %v1788_v3 = vpop.f32.mrb[2].mxu0 }
  0xdd   :  { %v163_v5 = vpop.f32.mrb[3].mxu0 }
  0xde   :  { %v164_v14 = vadd.f32 %v2220_v13, %v163_v5 }
  0xdf   :  { %v266_v17 = vpop.f32.mrb[0].mxu1 }
  0xe0   :  { %v270_v18 = vadd.f32 %v266_v17, %v154_v16  ;;  %v1805_v19 = vpop.f32.mrb[1].mxu1 }
  0xe1   :  { %v2277_v6 = vpop.f32.mrb[4].mxu0 }
  0xe2   :  { %v271_v21 = vadd.f32 %v270_v18, %v270_v18  ;;  %v2279_v7 = vpop.f32.mrb[5].mxu0 }
  0xe3   :  { %v174_v59 = vadd.f32 %v2220_v13, %v2279_v7 }
  0xe4   :  { %v272_v22 = vsel %vm2223_vm5, %v271_v21, %v270_v18 }
  0xe5   :  { %v1665_v23 = vmul.f32 -1.442695, %v272_v22  ;;  %v2281_v9 = vpop.f32.mrb[6].mxu0 }
  0xe6   :  { %v2283_v11 = vpop.f32.mrb[7].mxu0 }
  0xe7   :  { %2026 = vpow2.f32 %v1665_v23 }
  0xf1   :  { %v2027_v24 = vpop.eup %2026 }
  0xf2   :  { %v276_v25 = vadd.f32 1.0, %v2027_v24 }
  0xf4   :  { %2028 = vrcp.f32 %v276_v25 }
  0xfe   :  { %v2029_v26 = vpop.eup %2028 }
  0xff   :  { %v279_v27 = vadd.f32 %v2029_v26, %v2029_v26 }
 0x101   :  { %v1666_v28 = vadd.f32 -1.0, %v279_v27 }
 0x103   :  { %v281_v29 = vsel %vm2223_vm5, %v1666_v28, %v2029_v26 }
 0x104   :  { %284 = vrot.lane.b32.xlu0 %v281_v29, %s2107_s3  ;;  %v282_v32 = vmul.f32 0.0, %v281_v29 }
 0x176   :  { %v285_v30 = vpop.permute.xlu0 %284 }
 0x177   :  { %v287_v31 = vmul.f32 %v285_v30, %v281_v29 }
 0x179   :  { %289 = vrot.lane.b32.xlu0 %v287_v31, %s2108_s27 }
 0x1eb   :  { %v290_v33 = vpop.permute.xlu0 %289 }
 0x1ec   :  { %v292_v34 = vadd.f32 %v290_v33, %v282_v32 }
 0x1ee   :  { %2030 = vtanh.f32 %v292_v34 }
 0x1f8   :  { %v2031_v35 = vpop.eup %2030 }
 0x1f9   :  { %295 = vrot.lane.b32.xlu1 %v2031_v35, %s2107_s3 }
 0x26b   :  { %v296_v36 = vpop.permute.xlu1 %295 }
 0x26c   :  { %v298_v37 = vmul.f32 %v296_v36, %v281_v29 }
 0x26e   :  { %300 = vrot.lane.b32.xlu1 %v298_v37, %s2108_s27  ;;  %v169_v37 = vadd.f32 %v1788_v3, %v2220_v13 }
 0x2e0   :  { %v301_v38 = vpop.permute.xlu1 %300 }
 0x2e1   :  { %1815 = vmatmul.mubr.msk.f32.vlgmr.msra.gmra.mrb[2].mxu1 %vm196_vm6, %v301_v38 }
 0x2e2   :  { %1958 = vmatpush3.bf16.msra.mxu1 %v2179_v4  ;;  %1836 = vmatprep.mubr.msk.f32.mxu1 %vm2105_vm2, %v2106_v8 }
 0x2e3   :  { %1959 = vmatprep.subr.bf16.mxu1 %v2104_v0 }
 0x2e6   :  { %1961 = vmatpush3.bf16.msra.mxu1 %v2200_v10 }
 0x2e7   :  { %1968 = vmatprep.subr.bf16.mxu1 %v2104_v0 }
 0x3b4   :  { %v370_v40 = vpop.f32.mrb[2].mxu1 }
 0x3b5   :  { %v374_v41 = vadd.f32 %v370_v40, %v159_v39  ;;  %v1816_v42 = vpop.f32.mrb[3].mxu1 }
 0x3b7   :  { %v375_v43 = vadd.f32 %v374_v41, %v374_v41 }
 0x3b9   :  { %v376_v44 = vsel %vm2223_vm5, %v375_v43, %v374_v41 }
 0x3ba   :  { %v1668_v45 = vmul.f32 -1.442695, %v376_v44 }
 0x3bc   :  { %2032 = vpow2.f32 %v1668_v45 }
 0x3c6   :  { %v2033_v46 = vpop.eup %2032 }
 0x3c7   :  { %v380_v47 = vadd.f32 1.0, %v2033_v46 }
 0x3c9   :  { %2034 = vrcp.f32 %v380_v47 }
 0x3d3   :  { %v2035_v48 = vpop.eup %2034 }
 0x3d4   :  { %v383_v49 = vadd.f32 %v2035_v48, %v2035_v48 }
 0x3d6   :  { %v1669_v50 = vadd.f32 -1.0, %v383_v49 }
 0x3d8   :  { %v385_v51 = vsel %vm2223_vm5, %v1669_v50, %v2035_v48 }
 0x3d9   :  { %388 = vrot.lane.b32.xlu0 %v385_v51, %s2107_s3  ;;  %v386_v54 = vmul.f32 %v385_v51, %v292_v34 }
 0x44b   :  { %v389_v52 = vpop.permute.xlu0 %388 }
 0x44c   :  { %v391_v53 = vmul.f32 %v389_v52, %v385_v51 }
 0x44e   :  { %393 = vrot.lane.b32.xlu1 %v391_v53, %s2108_s27 }
 0x4c0   :  { %v394_v55 = vpop.permute.xlu1 %393 }
 0x4c1   :  { %v396_v56 = vadd.f32 %v394_v55, %v386_v54 }
 0x4c3   :  { %2036 = vtanh.f32 %v396_v56 }
 0x4cd   :  { %v2037_v63 = vpop.eup %2036 }
 0x4ce   :  { %399 = vrot.lane.b32.xlu0 %v2037_v63, %s2107_s3 }
 0x540   :  { %v400_v1 = vpop.permute.xlu0 %399 }
 0x541   :  { %v402_v2 = vmul.f32 %v400_v1, %v385_v51 }
 0x543   :  { %404 = vrot.lane.b32.xlu1 %v402_v2, %s2108_s27 }
 0x5b5   :  { %v405_v12 = vpop.permute.xlu1 %404 }
 0x5b6   :  { %1826 = vmatmul.mubr.msk.f32.vlgmr.msra.gmra.mrb[8].mxu0 %vm196_vm6, %v405_v12 }
 0x5b7   :  { %1964 = vmatpush3.bf16.msra.mxu0 %v2179_v4  ;;  %1847 = vmatprep.mubr.msk.f32.mxu0 %vm2105_vm2, %v2106_v8 }
 0x5b8   :  { %1965 = vmatprep.subr.bf16.mxu0 %v2104_v0 }
 0x5bb   :  { %1967 = vmatpush3.bf16.msra.mxu0 %v2200_v10 }
 0x5bc   :  { %1974 = vmatprep.subr.bf16.mxu0 %v2104_v0 }
 0x689   :  { %v474_v15 = vpop.f32.mrb[8].mxu0 }
 0x68a   :  { %v478_v16 = vadd.f32 %v474_v15, %v164_v14  ;;  %v1827_v17 = vpop.f32.mrb[9].mxu0 }
 0x68c   :  { %v479_v18 = vadd.f32 %v478_v16, %v478_v16 }
 0x68e   :  { %v480_v19 = vsel %vm2223_vm5, %v479_v18, %v478_v16 }
 0x68f   :  { %v1671_v21 = vmul.f32 -1.442695, %v480_v19 }
 0x691   :  { %2038 = vpow2.f32 %v1671_v21 }
 0x69b   :  { %v2039_v22 = vpop.eup %2038 }
 0x69c   :  { %v484_v23 = vadd.f32 1.0, %v2039_v22 }
 0x69e   :  { %2040 = vrcp.f32 %v484_v23 }
 0x6a8   :  { %v2041_v24 = vpop.eup %2040 }
 0x6a9   :  { %v487_v25 = vadd.f32 %v2041_v24, %v2041_v24 }
 0x6ab   :  { %v1672_v26 = vadd.f32 -1.0, %v487_v25 }
 0x6ad   :  { %v489_v27 = vsel %vm2223_vm5, %v1672_v26, %v2041_v24  ;;  %v179_v26 = vadd.f32 %v2277_v6, %v2220_v13 }
 0x6ae   :  { %492 = vrot.lane.b32.xlu0 %v489_v27, %s2107_s3  ;;  %v490_v30 = vmul.f32 %v489_v27, %v396_v56 }
 0x720   :  { %v493_v28 = vpop.permute.xlu0 %492 }
 0x721   :  { %v495_v29 = vmul.f32 %v493_v28, %v489_v27 }
 0x723   :  { %497 = vrot.lane.b32.xlu1 %v495_v29, %s2108_s27 }
 0x795   :  { %v498_v31 = vpop.permute.xlu1 %497 }
 0x796   :  { %v500_v32 = vadd.f32 %v498_v31, %v490_v30 }
 0x798   :  { %2042 = vtanh.f32 %v500_v32 }
 0x7a2   :  { %v2043_v33 = vpop.eup %2042 }
 0x7a3   :  { %503 = vrot.lane.b32.xlu0 %v2043_v33, %s2107_s3 }
 0x815   :  { %v504_v34 = vpop.permute.xlu0 %503 }
 0x816   :  { %v506_v35 = vmul.f32 %v504_v34, %v489_v27 }
 0x818   :  { %508 = vrot.lane.b32.xlu1 %v506_v35, %s2108_s27 }
 0x88a   :  { %v509_v36 = vpop.permute.xlu1 %508 }
 0x88b   :  { %1837 = vmatmul.mubr.msk.f32.vlgmr.msra.gmra.mrb[4].mxu1 %vm196_vm6, %v509_v36 }
 0x88c   :  { %1970 = vmatpush3.bf16.msra.mxu1 %v2179_v4  ;;  %1858 = vmatprep.mubr.msk.f32.mxu1 %vm2105_vm2, %v2106_v8 }
 0x88d   :  { %1971 = vmatprep.subr.bf16.mxu1 %v2104_v0 }
 0x890   :  { %1973 = vmatpush3.bf16.msra.mxu1 %v2200_v10 }
 0x891   :  { %1980 = vmatprep.subr.bf16.mxu1 %v2104_v0 }
 0x95e   :  { %v578_v38 = vpop.f32.mrb[4].mxu1 }
 0x95f   :  { %v582_v39 = vadd.f32 %v578_v38, %v169_v37  ;;  %v1838_v40 = vpop.f32.mrb[5].mxu1 }
 0x961   :  { %v583_v41 = vadd.f32 %v582_v39, %v582_v39 }
 0x963   :  { %v584_v42 = vsel %vm2223_vm5, %v583_v41, %v582_v39 }
 0x964   :  { %v1674_v43 = vmul.f32 -1.442695, %v584_v42 }
 0x966   :  { %2044 = vpow2.f32 %v1674_v43 }
 0x970   :  { %v2045_v44 = vpop.eup %2044 }
 0x971   :  { %v588_v45 = vadd.f32 1.0, %v2045_v44 }
 0x973   :  { %2046 = vrcp.f32 %v588_v45  ;;  %v184_v45 = vadd.f32 %v2220_v13, %v2283_v11 }
 0x97d   :  { %v2047_v46 = vpop.eup %2046 }
 0x97e   :  { %v591_v47 = vadd.f32 %v2047_v46, %v2047_v46 }
 0x980   :  { %v1675_v48 = vadd.f32 -1.0, %v591_v47 }
 0x982   :  { %v593_v49 = vsel %vm2223_vm5, %v1675_v48, %v2047_v46 }
 0x983   :  { %596 = vrot.lane.b32.xlu0 %v593_v49, %s2107_s3  ;;  %v594_v52 = vmul.f32 %v593_v49, %v500_v32 }
 0x9f5   :  { %v597_v50 = vpop.permute.xlu0 %596 }
 0x9f6   :  { %v599_v51 = vmul.f32 %v597_v50, %v593_v49 }
 0x9f8   :  { %601 = vrot.lane.b32.xlu1 %v599_v51, %s2108_s27 }
 0xa6a   :  { %v602_v53 = vpop.permute.xlu1 %601 }
 0xa6b   :  { %v604_v54 = vadd.f32 %v602_v53, %v594_v52 }
 0xa6d   :  { %2048 = vtanh.f32 %v604_v54 }
 0xa77   :  { %v2049_v55 = vpop.eup %2048 }
 0xa78   :  { %607 = vrot.lane.b32.xlu0 %v2049_v55, %s2107_s3 }
 0xaea   :  { %v608_v56 = vpop.permute.xlu0 %607 }
 0xaeb   :  { %v610_v57 = vmul.f32 %v608_v56, %v593_v49 }
 0xaed   :  { %612 = vrot.lane.b32.xlu1 %v610_v57, %s2108_s27 }
 0xb5f   :  { %v613_v58 = vpop.permute.xlu1 %612 }
 0xb60   :  { %1848 = vmatmul.mubr.msk.f32.vlgmr.msra.gmra.mrb[10].mxu0 %vm196_vm6, %v613_v58 }
 0xb61   :  { %1976 = vmatpush3.bf16.msra.mxu0 %v2179_v4  ;;  %1869 = vmatprep.mubr.msk.f32.mxu0 %vm2105_vm2, %v2106_v8 }
 0xb62   :  { %1977 = vmatprep.subr.bf16.mxu0 %v2104_v0 }
 0xb65   :  { %1979 = vmatpush3.bf16.msra.mxu0 %v2200_v10 }
 0xb66   :  { %1986 = vmatprep.subr.bf16.mxu0 %v2104_v0 }
 0xc33   :  { %v682_v60 = vpop.f32.mrb[10].mxu0 }
 0xc34   :  { %v686_v61 = vadd.f32 %v682_v60, %v174_v59  ;;  %v1849_v62 = vpop.f32.mrb[11].mxu0 }
 0xc36   :  { %v687_v63 = vadd.f32 %v686_v61, %v686_v61 }
 0xc38   :  { %v688_v1 = vsel %vm2223_vm5, %v687_v63, %v686_v61 }
 0xc39   :  { %v1677_v2 = vmul.f32 -1.442695, %v688_v1 }
 0xc3b   :  { %2050 = vpow2.f32 %v1677_v2 }
 0xc45   :  { %v2051_v3 = vpop.eup %2050 }
 0xc46   :  { %v692_v5 = vadd.f32 1.0, %v2051_v3  ;;  %v189_v3 = vadd.f32 %v2281_v9, %v2220_v13 }
 0xc48   :  { %2052 = vrcp.f32 %v692_v5 }
 0xc52   :  { %v2053_v12 = vpop.eup %2052 }
 0xc53   :  { %v695_v14 = vadd.f32 %v2053_v12, %v2053_v12 }
 0xc55   :  { %v1678_v15 = vadd.f32 -1.0, %v695_v14 }
 0xc57   :  { %v697_v16 = vsel %vm2223_vm5, %v1678_v15, %v2053_v12 }
 0xc58   :  { %700 = vrot.lane.b32.xlu0 %v697_v16, %s2107_s3  ;;  %v698_v18 = vmul.f32 %v697_v16, %v604_v54 }
 0xcca   :  { %v701_v7 = vpop.permute.xlu0 %700 }
 0xccb   :  { %v703_v17 = vmul.f32 %v701_v7, %v697_v16 }
 0xccd   :  { %705 = vrot.lane.b32.xlu1 %v703_v17, %s2108_s27 }
 0xd3f   :  { %v706_v19 = vpop.permute.xlu1 %705 }
 0xd40   :  { %v708_v21 = vadd.f32 %v706_v19, %v698_v18 }
 0xd42   :  { %2054 = vtanh.f32 %v708_v21 }
 0xd4c   :  { %v2055_v22 = vpop.eup %2054 }
 0xd4d   :  { %711 = vrot.lane.b32.xlu0 %v2055_v22, %s2107_s3 }
 0xdbf   :  { %v712_v23 = vpop.permute.xlu0 %711 }
 0xdc0   :  { %v714_v24 = vmul.f32 %v712_v23, %v697_v16 }
 0xdc2   :  { %716 = vrot.lane.b32.xlu1 %v714_v24, %s2108_s27 }
 0xe34   :  { %v717_v25 = vpop.permute.xlu1 %716 }
 0xe35   :  { %1859 = vmatmul.mubr.msk.f32.vlgmr.msra.gmra.mrb[6].mxu1 %vm196_vm6, %v717_v25 }
 0xe36   :  { %1982 = vmatpush3.bf16.msra.mxu1 %v2179_v4  ;;  %1880 = vmatprep.mubr.msk.f32.mxu1 %vm2105_vm2, %v2106_v8 }
 0xe37   :  { %1983 = vmatprep.subr.bf16.mxu1 %v2104_v0 }
 0xe3a   :  { %1985 = vmatpush3.bf16.msra.mxu1 %v2200_v10 }
 0xe3b   :  { %1992 = vmatprep.subr.bf16.mxu1 %v2104_v0 }
 0xf08   :  { %v786_v27 = vpop.f32.mrb[6].mxu1 }
 0xf09   :  { %v790_v28 = vadd.f32 %v786_v27, %v179_v26  ;;  %v1860_v29 = vpop.f32.mrb[7].mxu1  ;;  %v1027_v27 = vld [vmem:[%s2506_s4] sm:$0xff] }
 0xf0a   :  { %v1029_v29 = vld [vmem:[%s2506_s4 + $0x10] sm:$0xff] }
 0xf0b   :  { %v791_v30 = vadd.f32 %v790_v28, %v790_v28 }
 0xf0d   :  { %v792_v31 = vsel %vm2223_vm5, %v791_v30, %v790_v28  ;;  %v1028_v28 = vld [vmem:[%s2506_s4 + $0x8] sm:$0xff] }
 0xf0e   :  { %v1680_v4 = vmul.f32 -1.442695, %v792_v31  ;;  %v1987_v30 = vpack.c.bf16 %v1028_v28, %v1027_v27  ;;  %v1030_v31 = vld [vmem:[%s2506_s4 + $0x18] sm:$0xff] }
 0xf10   :  { %2056 = vpow2.f32 %v1680_v4  ;;  %v1990_v4 = vpack.c.bf16 %v1030_v31, %v1029_v29 }
 0xf1a   :  { %v2057_v32 = vpop.eup %2056 }
 0xf1b   :  { %v796_v33 = vadd.f32 1.0, %v2057_v32 }
 0xf1d   :  { %2058 = vrcp.f32 %v796_v33 }
 0xf27   :  { %v2059_v34 = vpop.eup %2058 }
 0xf28   :  { %v799_v35 = vadd.f32 %v2059_v34, %v2059_v34 }
 0xf2a   :  { %v1681_v10 = vadd.f32 -1.0, %v799_v35 }
 0xf2c   :  { %v801_v36 = vsel %vm2223_vm5, %v1681_v10, %v2059_v34  ;;  %v1688_v10 = vld [vmem:[%s2507_s5] ss:$0 sm:$0xff] }
 0xf2d   :  { %804 = vrot.lane.b32.xlu0 %v801_v36, %s2107_s3  ;;  %v802_v38 = vmul.f32 %v801_v36, %v708_v21 }
 0xf9f   :  { %v805_v6 = vpop.permute.xlu0 %804 }
 0xfa0   :  { %v807_v37 = vmul.f32 %v805_v6, %v801_v36 }
 0xfa2   :  { %809 = vrot.lane.b32.xlu1 %v807_v37, %s2108_s27 }
0x1014   :  { %v810_v39 = vpop.permute.xlu1 %809 }
0x1015   :  { %v812_v40 = vadd.f32 %v810_v39, %v802_v38 }
0x1017   :  { %2060 = vtanh.f32 %v812_v40 }
0x1021   :  { %v2061_v41 = vpop.eup %2060 }
0x1022   :  { %815 = vrot.lane.b32.xlu0 %v2061_v41, %s2107_s3 }
0x1094   :  { %v816_v42 = vpop.permute.xlu0 %815 }
0x1095   :  { %v818_v43 = vmul.f32 %v816_v42, %v801_v36 }
0x1097   :  { %820 = vrot.lane.b32.xlu1 %v818_v43, %s2108_s27 }
0x1109   :  { %v821_v44 = vpop.permute.xlu1 %820 }
0x110a   :  { %1870 = vmatmul.mubr.msk.f32.vlgmr.msra.gmra.mrb[12].mxu0 %vm196_vm6, %v821_v44 }
0x110b   :  { %1891 = vmatprep.mubr.msk.f32.mxu0 %vm2105_vm2, %v2106_v8  ;;  %1988 = vmatpush3.bf16.msra.mxu0 %v1987_v30 }
0x110c   :  { %1989 = vmatprep.subr.bf16.mxu0 %v2104_v0 }
0x110f   :  { %1991 = vmatpush3.bf16.msra.mxu0 %v1990_v4 }
0x1110   :  { %1998 = vmatprep.subr.bf16.mxu0 %v2104_v0 }
0x11dd   :  { %v890_v46 = vpop.f32.mrb[12].mxu0 }
0x11de   :  { %v894_v47 = vadd.f32 %v890_v46, %v184_v45  ;;  %v1871_v48 = vpop.f32.mrb[13].mxu0 }
0x11e0   :  { %v895_v49 = vadd.f32 %v894_v47, %v894_v47 }
0x11e2   :  { %v896_v50 = vsel %vm2223_vm5, %v895_v49, %v894_v47 }
0x11e3   :  { %v1683_v51 = vmul.f32 -1.442695, %v896_v50 }
0x11e5   :  { %2062 = vpow2.f32 %v1683_v51 }
0x11ef   :  { %v2063_v52 = vpop.eup %2062 }
0x11f0   :  { %v900_v53 = vadd.f32 1.0, %v2063_v52  ;;  %v1032_v52 = vld [vmem:[%s2508_s6] sm:$0xff] }
0x11f2   :  { %2064 = vrcp.f32 %v900_v53  ;;  %v1033_v53 = vld [vmem:[%s2508_s6 + $0x8] sm:$0xff] }
0x11fc   :  { %v2065_v54 = vpop.eup %2064 }
0x11fd   :  { %v903_v55 = vadd.f32 %v2065_v54, %v2065_v54 }
0x11ff   :  { %v1684_v56 = vadd.f32 -1.0, %v903_v55  ;;  %v1993_v55 = vpack.c.bf16 %v1033_v53, %v1032_v52 }
0x1201   :  { %v905_v57 = vsel %vm2223_vm5, %v1684_v56, %v2065_v54  ;;  %v1034_v54 = vld [vmem:[%s2508_s6 + $0x10] sm:$0xff]  ;;  %v1035_v56 = vld [vmem:[%s2508_s6 + $0x18] sm:$0xff] }
0x1202   :  { %908 = vrot.lane.b32.xlu0 %v905_v57, %s2107_s3  ;;  %v906_v59 = vmul.f32 %v905_v57, %v812_v40 }
0x1274   :  { %v909_v11 = vpop.permute.xlu0 %908 }
0x1275   :  { %v911_v58 = vmul.f32 %v909_v11, %v905_v57 }
0x1277   :  { %913 = vrot.lane.b32.xlu1 %v911_v58, %s2108_s27 }
0x12e9   :  { %v914_v60 = vpop.permute.xlu1 %913 }
0x12ea   :  { %v916_v61 = vadd.f32 %v914_v60, %v906_v59 }
0x12ec   :  { %2066 = vtanh.f32 %v916_v61 }
0x12f6   :  { %v2067_v62 = vpop.eup %2066 }
0x12f7   :  { %919 = vrot.lane.b32.xlu0 %v2067_v62, %s2107_s3 }
0x1369   :  { %v920_v63 = vpop.permute.xlu0 %919 }
0x136a   :  { %v922_v1 = vmul.f32 %v920_v63, %v905_v57  ;;  %v1996_v57 = vpack.c.bf16 %v1035_v56, %v1034_v54 }
0x136c   :  { %924 = vrot.lane.b32.xlu1 %v922_v1, %s2108_s27 }
0x13de   :  { %v925_v2 = vpop.permute.xlu1 %924 }
0x13df   :  { %1881 = vmatmul.mubr.msk.f32.vlgmr.msra.gmra.mrb[8].mxu1 %vm196_vm6, %v925_v2 }
0x13e0   :  { %1902 = vmatprep.mubr.msk.f32.mxu1 %vm2105_vm2, %v2106_v8  ;;  %1994 = vmatpush3.bf16.msra.mxu1 %v1993_v55 }
0x13e1   :  { %1995 = vmatprep.subr.bf16.mxu1 %v2104_v0 }
0x13e4   :  { %1997 = vmatpush3.bf16.msra.mxu1 %v1996_v57 }
0x13e5   :  { %2004 = vmatprep.subr.bf16.mxu1 %v2104_v0 }
0x14b2   :  { %v994_v5 = vpop.f32.mrb[8].mxu1 }
0x14b3   :  { %v998_v12 = vadd.f32 %v994_v5, %v189_v3  ;;  %v1882_v14 = vpop.f32.mrb[9].mxu1 }
0x14b5   :  { %v999_v15 = vadd.f32 %v998_v12, %v998_v12 }
0x14b7   :  { %v1000_v16 = vsel %vm2223_vm5, %v999_v15, %v998_v12 }
0x14b8   :  { %v1686_v7 = vmul.f32 -1.442695, %v1000_v16 }
0x14ba   :  { %2068 = vpow2.f32 %v1686_v7 }
0x14c4   :  { %v2069_v17 = vpop.eup %2068 }
0x14c5   :  { %v1004_v18 = vadd.f32 1.0, %v2069_v17 }
0x14c7   :  { %2070 = vrcp.f32 %v1004_v18 }
0x14d1   :  { %v2071_v19 = vpop.eup %2070 }
0x14d2   :  { %v1007_v21 = vadd.f32 %v2071_v19, %v2071_v19 }
0x14d4   :  { %v1687_v22 = vadd.f32 -1.0, %v1007_v21 }
0x14d6   :  { %v1009_v23 = vsel %vm2223_vm5, %v1687_v22, %v2071_v19 }
0x14d7   :  { %1012 = vrot.lane.b32.xlu0 %v1009_v23, %s2107_s3  ;;  %v1010_v24 = vmul.f32 %v1009_v23, %v916_v61  ;;  %v2431_v61 = vld [vmem:[%s2509_s7] ss:$0 sm:$0xff] }
0x1549   :  { %v1013_v13 = vpop.permute.xlu0 %1012 }
0x154a   :  { %v1015_v9 = vmul.f32 %v1013_v13, %v1009_v23 }
0x154c   :  { %1017 = vrot.lane.b32.xlu1 %v1015_v9, %s2108_s27 }
0x15be   :  { %v1018_v25 = vpop.permute.xlu1 %1017 }
0x15bf   :  { %v1020_v26 = vadd.f32 %v1018_v25, %v1010_v24 }
0x15c1   :  { %2072 = vtanh.f32 %v1020_v26 }
0x15cb   :  { %v2073_v32 = vpop.eup %2072 }
0x15cc   :  { %1023 = vrot.lane.b32.xlu0 %v2073_v32, %s2107_s3 }
0x163e   :  { %v1024_v33 = vpop.permute.xlu0 %1023 }
0x163f   :  { %v1026_v34 = vmul.f32 %v1024_v33, %v1009_v23 }
0x1641   :  { %1044 = vrot.lane.b32.xlu1 %v1026_v34, %s2108_s27 }
0x16b3   :  { %v1045_v35 = vpop.permute.xlu1 %1044 }
0x16b4   :  { %1892 = vmatmul.mubr.msk.f32.vlgmr.msra.gmra.mrb[14].mxu0 %vm196_vm6, %v1045_v35 }
0x16b5   :  { %1913 = vmatprep.mubr.msk.f32.mxu0 %vm2105_vm2, %v2106_v8  ;;  %2000 = vmatpush3.bf16.msra.mxu0 %v1993_v55 }
0x16b6   :  { %2001 = vmatprep.subr.bf16.mxu0 %v2104_v0 }
0x16b9   :  { %2003 = vmatpush3.bf16.msra.mxu0 %v1996_v57 }
0x16ba   :  { %2010 = vmatprep.subr.bf16.mxu0 %v2104_v0 }
0x1787   :  { %v1114_v36 = vpop.f32.mrb[14].mxu0 }
0x1788   :  { %v1115_v6 = vadd.f32 %v1688_v10, %v1114_v36  ;;  %v1893_v37 = vpop.f32.mrb[15].mxu0 }
0x178a   :  { %v1118_v38 = vadd.f32 %v1115_v6, %v1115_v6 }
0x178c   :  { %v1119_v39 = vsel %vm2223_vm5, %v1118_v38, %v1115_v6 }
0x178d   :  { %v1690_v40 = vmul.f32 -1.442695, %v1119_v39 }
0x178f   :  { %2074 = vpow2.f32 %v1690_v40 }
0x1799   :  { %v2075_v41 = vpop.eup %2074 }
0x179a   :  { %v1123_v42 = vadd.f32 1.0, %v2075_v41 }
0x179c   :  { %2076 = vrcp.f32 %v1123_v42 }
0x17a6   :  { %v2077_v43 = vpop.eup %2076 }
0x17a7   :  { %v1126_v44 = vadd.f32 %v2077_v43, %v2077_v43 }
0x17a9   :  { %v1691_v45 = vadd.f32 -1.0, %v1126_v44 }
0x17ab   :  { %v1128_v46 = vsel %vm2223_vm5, %v1691_v45, %v2077_v43 }
0x17ac   :  { %1131 = vrot.lane.b32.xlu0 %v1128_v46, %s2107_s3  ;;  %v1129_v49 = vmul.f32 %v1128_v46, %v1020_v26 }
0x181e   :  { %v1132_v47 = vpop.permute.xlu0 %1131 }
0x181f   :  { %v1134_v48 = vmul.f32 %v1132_v47, %v1128_v46 }
0x1821   :  { %1136 = vrot.lane.b32.xlu1 %v1134_v48, %s2108_s27 }
0x1893   :  { %v1137_v50 = vpop.permute.xlu1 %1136 }
0x1894   :  { %v1139_v51 = vadd.f32 %v1137_v50, %v1129_v49 }
0x1896   :  { %2078 = vtanh.f32 %v1139_v51 }
0x18a0   :  { %v2079_v11 = vpop.eup %2078 }
0x18a1   :  { %1142 = vrot.lane.b32.xlu0 %v2079_v11, %s2107_s3 }
0x1913   :  { %v1143_v58 = vpop.permute.xlu0 %1142 }
0x1914   :  { %v2420_v59 = vmul.f32 %v1143_v58, %v1128_v46 }
0x1916   :  { %1153 = vrot.lane.b32.xlu1 %v2420_v59, %s2108_s27 }
0x1988   :  { %v1154_v60 = vpop.permute.xlu1 %1153 }
0x1989   :  { %1903 = vmatmul.mubr.msk.f32.vlgmr.msra.gmra.mrb[10].mxu1 %vm196_vm6, %v1154_v60 }
0x198a   :  { %2006 = vmatpush3.bf16.msra.mxu1 %v1993_v55  ;;  %1924 = vmatprep.mubr.msk.f32.mxu1 %vm2105_vm2, %v2106_v8 }
0x198b   :  { %2007 = vmatprep.subr.bf16.mxu1 %v2104_v0 }
0x198e   :  { %2009 = vmatpush3.bf16.msra.mxu1 %v1996_v57 }
0x1a5c   :  { %v1223_v62 = vpop.f32.mrb[10].mxu1 }
0x1a5d   :  { %v1224_v63 = vadd.f32 %v2431_v61, %v1223_v62  ;;  %v1904_v1 = vpop.f32.mrb[11].mxu1 }
0x1a5f   :  { %v1227_v2 = vadd.f32 %v1224_v63, %v1224_v63 }
0x1a61   :  { %v1228_v3 = vsel %vm2223_vm5, %v1227_v2, %v1224_v63 }
0x1a62   :  { %v1694_v5 = vmul.f32 -1.442695, %v1228_v3 }
0x1a64   :  { %2080 = vpow2.f32 %v1694_v5 }
0x1a6e   :  { %v2081_v12 = vpop.eup %2080 }
0x1a6f   :  { %v1232_v14 = vadd.f32 1.0, %v2081_v12 }
0x1a71   :  { %2082 = vrcp.f32 %v1232_v14 }
0x1a7b   :  { %v2083_v15 = vpop.eup %2082 }
0x1a7c   :  { %v1235_v16 = vadd.f32 %v2083_v15, %v2083_v15 }
0x1a7e   :  { %v1695_v7 = vadd.f32 -1.0, %v1235_v16 }
0x1a80   :  { %v1237_v17 = vsel %vm2223_vm5, %v1695_v7, %v2083_v15 }
0x1a81   :  { %1240 = vrot.lane.b32.xlu0 %v1237_v17, %s2107_s3  ;;  %v1238_v21 = vmul.f32 %v1237_v17, %v1139_v51 }
0x1af3   :  { %v1241_v18 = vpop.permute.xlu0 %1240 }
0x1af4   :  { %v1243_v19 = vmul.f32 %v1241_v18, %v1237_v17 }
0x1af6   :  { %1245 = vrot.lane.b32.xlu1 %v1243_v19, %s2108_s27 }
0x1b68   :  { %v1246_v22 = vpop.permute.xlu1 %1245 }
0x1b69   :  { %v1248_v23 = vadd.f32 %v1246_v22, %v1238_v21 }
0x1b6b   :  { %2084 = vtanh.f32 %v1248_v23 }
0x1b75   :  { %v2085_v13 = vpop.eup %2084 }
0x1b76   :  { %1251 = vrot.lane.b32.xlu0 %v2085_v13, %s2107_s3 }
0x1be8   :  { %v1252_v9 = vpop.permute.xlu0 %1251 }
0x1be9   :  { %v2441_v24 = vmul.f32 %v1252_v9, %v1237_v17 }
0x1beb   :  { %1256 = vrot.lane.b32.xlu1 %v2441_v24, %s2108_s27 }
0x1c5d   :  { %v1257_v25 = vpop.permute.xlu1 %1256 }
0x1c5e   :  { %1914 = vmatmul.mubr.msk.f32.vlgmr.msra.gmra.mrb[16].mxu0 %vm196_vm6, %v1257_v25 }
0x1c5f   :  { %2012 = vmatpush3.bf16.msra.mxu0 %v1993_v55  ;;  %1935 = vmatprep.mubr.msk.f32.mxu0 %vm2105_vm2, %v2106_v8 }
0x1c60   :  { %2013 = vmatprep.subr.bf16.mxu0 %v2104_v0 }
0x1c63   :  { %2015 = vmatpush3.bf16.msra.mxu0 %v1996_v57 }
0x1d31   :  { %v1326_v26 = vpop.f32.mrb[16].mxu0 }
0x1d32   :  { %v1327_v27 = vadd.f32 %v2431_v61, %v1326_v26  ;;  %v1915_v28 = vpop.f32.mrb[17].mxu0 }
0x1d34   :  { %v1330_v29 = vadd.f32 %v1327_v27, %v1327_v27 }
0x1d36   :  { %v1331_v30 = vsel %vm2223_vm5, %v1330_v29, %v1327_v27 }
0x1d37   :  { %v1697_v31 = vmul.f32 -1.442695, %v1331_v30 }
0x1d39   :  { %2086 = vpow2.f32 %v1697_v31 }
0x1d43   :  { %v2087_v4 = vpop.eup %2086 }
0x1d44   :  { %v1335_v32 = vadd.f32 1.0, %v2087_v4 }
0x1d46   :  { %2088 = vrcp.f32 %v1335_v32 }
0x1d50   :  { %v2089_v33 = vpop.eup %2088 }
0x1d51   :  { %v1338_v34 = vadd.f32 %v2089_v33, %v2089_v33 }
0x1d53   :  { %v1698_v35 = vadd.f32 -1.0, %v1338_v34 }
0x1d55   :  { %v1340_v0 = vsel %vm2223_vm5, %v1698_v35, %v2089_v33 }
0x1d56   :  { %1343 = vrot.lane.b32.xlu0 %v1340_v0, %s2107_s3  ;;  %v1341_v36 = vmul.f32 %v1340_v0, %v1248_v23 }
0x1dc8   :  { %v1344_v8 = vpop.permute.xlu0 %1343 }
0x1dc9   :  { %v1346_v10 = vmul.f32 %v1344_v8, %v1340_v0 }
0x1dcb   :  { %1348 = vrot.lane.b32.xlu1 %v1346_v10, %s2108_s27 }
0x1e3d   :  { %v1349_v6 = vpop.permute.xlu1 %1348 }
0x1e3e   :  { %v1351_v37 = vadd.f32 %v1349_v6, %v1341_v36 }
0x1e40   :  { %2090 = vtanh.f32 %v1351_v37 }
0x1e4a   :  { %v2091_v38 = vpop.eup %2090 }
0x1e4b   :  { %1354 = vrot.lane.b32.xlu0 %v2091_v38, %s2107_s3 }
0x1ebd   :  { %v1355_v39 = vpop.permute.xlu0 %1354 }
0x1ebe   :  { %v2457_v40 = vmul.f32 %v1355_v39, %v1340_v0 }
0x1ec0   :  { %1359 = vrot.lane.b32.xlu1 %v2457_v40, %s2108_s27 }
0x1f32   :  { %v1360_v41 = vpop.permute.xlu1 %1359 }
0x1f33   :  { %1925 = vmatmul.mubr.msk.f32.vlgmr.msra.gmra.mrb[12].mxu1 %vm196_vm6, %v1360_v41 }
0x2006   :  { %v1429_v42 = vpop.f32.mrb[12].mxu1 }
0x2007   :  { %v1430_v43 = vadd.f32 %v2431_v61, %v1429_v42  ;;  %v1926_v44 = vpop.f32.mrb[13].mxu1 }
0x2009   :  { %v1433_v45 = vadd.f32 %v1430_v43, %v1430_v43 }
0x200b   :  { %v1434_v46 = vsel %vm2223_vm5, %v1433_v45, %v1430_v43 }
0x200c   :  { %v1700_v47 = vmul.f32 -1.442695, %v1434_v46 }
0x200e   :  { %2092 = vpow2.f32 %v1700_v47 }
0x2018   :  { %v2093_v48 = vpop.eup %2092 }
0x2019   :  { %v1438_v49 = vadd.f32 1.0, %v2093_v48 }
0x201b   :  { %2094 = vrcp.f32 %v1438_v49 }
0x2025   :  { %v2095_v50 = vpop.eup %2094 }
0x2026   :  { %v1441_v51 = vadd.f32 %v2095_v50, %v2095_v50 }
0x2028   :  { %v1701_v52 = vadd.f32 -1.0, %v1441_v51 }
0x202a   :  { %v1443_v53 = vsel %vm2223_vm5, %v1701_v52, %v2095_v50 }
0x202b   :  { %1446 = vrot.lane.b32.xlu0 %v1443_v53, %s2107_s3  ;;  %v1444_v56 = vmul.f32 %v1443_v53, %v1351_v37 }
0x209d   :  { %v1447_v54 = vpop.permute.xlu0 %1446 }
0x209e   :  { %v1449_v55 = vmul.f32 %v1447_v54, %v1443_v53 }
0x20a0   :  { %1451 = vrot.lane.b32.xlu1 %v1449_v55, %s2108_s27 }
0x2112   :  { %v1452_v57 = vpop.permute.xlu1 %1451 }
0x2113   :  { %v1454_v11 = vadd.f32 %v1452_v57, %v1444_v56 }
0x2115   :  { %2096 = vtanh.f32 %v1454_v11 }
0x211f   :  { %v2097_v58 = vpop.eup %2096 }
0x2120   :  { %1457 = vrot.lane.b32.xlu0 %v2097_v58, %s2107_s3 }
0x2192   :  { %v1458_v60 = vpop.permute.xlu0 %1457 }
0x2193   :  { %v1460_v62 = vmul.f32 %v1458_v60, %v1443_v53 }
0x2195   :  { %1462 = vrot.lane.b32.xlu1 %v1460_v62, %s2108_s27 }
0x2207   :  { %v1463_v63 = vpop.permute.xlu1 %1462 }
0x2208   :  { %1936 = vmatmul.mubr.msk.f32.vlgmr.msra.gmra.mrb[18].mxu0 %vm196_vm6, %v1463_v63 }
0x22db   :  { %v1532_v1 = vpop.f32.mrb[18].mxu0 }
0x22dc   :  { %v1533_v2 = vadd.f32 %v2431_v61, %v1532_v1  ;;  %v1937_v3 = vpop.f32.mrb[19].mxu0  ;;  %v1705_v61 = vld [vmem:[%s2510_s8] ss:$0 sm:$0xff] }
0x22de   :  { %v1536_v5 = vadd.f32 %v1533_v2, %v1533_v2 }
0x22e0   :  { %v1537_v12 = vsel %vm2223_vm5, %v1536_v5, %v1533_v2 }
0x22e1   :  { %v1703_v14 = vmul.f32 -1.442695, %v1537_v12 }
0x22e3   :  { %2098 = vpow2.f32 %v1703_v14 }
0x22ed   :  { %v2099_v15 = vpop.eup %2098 }
0x22ee   :  { %v1541_v16 = vadd.f32 1.0, %v2099_v15 }
0x22f0   :  { %2100 = vrcp.f32 %v1541_v16 }
0x22fa   :  { %v2101_v7 = vpop.eup %2100 }
0x22fb   :  { %v1544_v17 = vadd.f32 %v2101_v7, %v2101_v7 }
0x22fd   :  { %v1704_v18 = vadd.f32 -1.0, %v1544_v17 }
0x22ff   :  { %v1546_v19 = vsel %vm2223_vm5, %v1704_v18, %v2101_v7 }
0x2300   :  { %1549 = vrot.lane.b32.xlu0 %v1546_v19, %s2107_s3  ;;  %v1547_v25 = vmul.f32 %v1546_v19, %v1454_v11 }
0x2304   :  { %1571 = vrot.lane.b32.xlu0 %v1705_v61, %s2109_s16 }
0x2372   :  { %v1550_v21 = vpop.permute.xlu0 %1549 }
0x2373   :  { %v1552_v22 = vmul.f32 %v1550_v21, %v1546_v19 }
0x2375   :  { %1554 = vrot.lane.b32.xlu1 %v1552_v22, %s2108_s27 }
0x2376   :  { %v1572_v23 = vpop.permute.xlu0 %1571 }
0x2377   :  { %v1589_v13 = vmul.f32 %v1572_v23, %v2441_v24  ;;  %v1607_v9 = vmul.f32 %v1572_v23, %v1460_v62  ;;  %v1574_v20 = vmul.f32 %v1572_v23, %v2420_v59  ;;  %v1598_v29 = vmul.f32 %v1572_v23, %v2457_v40 }
0x2378   :  { %v15_v24 = vstv %s2511_s9  ;;  %s2110_s9 = smov 2  }
0x2379   :  { %1591 = vrot.lane.b32.xlu0 %v1589_v13, %s2108_s27  ;;  %16 = vst [vmem:[#allocation2] sm:$0x1] %v15_v24 }
0x237d   :  { %1609 = vrot.lane.b32.xlu0 %v1607_v9, %s2108_s27 }
0x2380   :  { %v1706_v37 = vld [vmem:[#allocation2] ss:$0 sm:$0xff] }
0x2381   :  { %1576 = vrot.lane.b32.xlu0 %v1574_v20, %s2108_s27 }
0x23e7   :  { %v1555_v26 = vpop.permute.xlu1 %1554 }
0x23e8   :  { %v1557_v27 = vadd.f32 %v1555_v26, %v1547_v25 }
0x23ea   :  { %2102 = vtanh.f32 %v1557_v27 }
0x23eb   :  { %v1592_v30 = vpop.permute.xlu0 %1591 }
0x23ec   :  { %v1594_v10 = vsel %vm196_vm6, %v1592_v30, 0.0 }
0x23ef   :  { %v1610_v32 = vpop.permute.xlu0 %1609 }
0x23f0   :  { %v1612_v35 = vsel %vm196_vm6, %v1610_v32, 0.0 }
0x23f3   :  { %v1577_v0 = vpop.permute.xlu0 %1576 }
0x23f4   :  { %v2103_v28 = vpop.eup %2102  ;;  %v1579_v8 = vsel %vm196_vm6, %v1577_v0, 0.0 }
0x23f5   :  { %1560 = vrot.lane.b32.xlu1 %v2103_v28, %s2107_s3  ;;  %s2111_s3 = smov 1  }
0x23f9   :  { %1600 = vrot.lane.b32.xlu1 %v1598_v29, %s2108_s27 }
0x2467   :  { %v1561_v59 = vpop.permute.xlu1 %1560 }
0x2468   :  { %v1563_v31 = vmul.f32 %v1561_v59, %v1546_v19 }
0x246a   :  { %v1616_v4 = vmul.f32 %v1572_v23, %v1563_v31 }
0x246b   :  { %v1601_v33 = vpop.permute.xlu1 %1600 }
0x246c   :  { %1618 = vrot.lane.b32.xlu1 %v1616_v4, %s2108_s27  ;;  %v1603_v34 = vsel %vm196_vm6, %v1601_v33, 0.0  ;;  %s2112_s27 = smov 3  }
0x246d   :  { %1604 = vadd.xlane.f32.xlu0 %v1603_v34 }
0x2471   :  { %1613 = vadd.xlane.f32.xlu0 %v1612_v35 }
0x2475   :  { %1580 = vadd.xlane.f32.xlu0 %v1579_v8 }
0x2490   :  { %1595 = vadd.xlane.f32.xlu1 %v1594_v10 }
0x24de   :  { %v1619_v36 = vpop.permute.xlu1 %1618 }
0x24df   :  { %v1621_v6 = vsel %vm196_vm6, %v1619_v36, 0.0 }
0x24e0   :  { %1622 = vadd.xlane.f32.xlu1 %v1621_v6 }
0x24fa   :  { %v1605_v38 = vpop.xlane.xlu0 %1604 }
0x24fb   :  { %v1606_v39 = vadd.f32 %v1706_v37, %v1605_v38 }
0x24fd   :  { %1630 = vrot.lane.b32.xlu0 %v1606_v39, %s2110_s9 }
0x24fe   :  { %v1614_v42 = vpop.xlane.xlu0 %1613 }
0x24ff   :  { %v1615_v43 = vadd.f32 %v1706_v37, %v1614_v42 }
0x2502   :  { %v1581_v47 = vpop.xlane.xlu0 %1580 }
0x2503   :  { %v1588_v48 = vadd.f32 %v1706_v37, %v1581_v47 }
0x251d   :  { %v1596_v40 = vpop.xlane.xlu1 %1595 }
0x251e   :  { %v1597_v41 = vadd.f32 %v1706_v37, %v1596_v40 }
0x2520   :  { %1626 = vrot.lane.b32.xlu1 %v1597_v41, %s2111_s3 }
0x2524   :  { %1634 = vrot.lane.b32.xlu1 %v1615_v43, %s2112_s27 }
0x256d   :  { %v1623_v44 = vpop.xlane.xlu1 %1622 }
0x256e   :  { %v1624_v45 = vadd.f32 %v1706_v37, %v1623_v44 }
0x256f   :  { %v1631_v51 = vpop.permute.xlu0 %1630 }
0x2570   :  { %1638 = vrot.lane.b32.xlu1 %v1624_v45, %s2113_s18 }
0x2592   :  { %v1627_v46 = vpop.permute.xlu1 %1626 }
0x2593   :  { %v1642_v49 = vsel %vm1641_vm7, %v1588_v48, %v1627_v46 }
0x2594   :  { %v1644_v52 = vsel %vm1643_vm8, %v1642_v49, %v1631_v51 }
0x2596   :  { %v1635_v50 = vpop.permute.xlu1 %1634 }
0x2597   :  { %v1646_v53 = vsel %vm1645_vm9, %v1644_v52, %v1635_v50 }
0x25e2   :  { %v1639_v54 = vpop.permute.xlu1 %1638 }
0x25e3   :  { %v1648_v55 = vsel %vm1647_vm10, %v1646_v53, %v1639_v54 }
0x25e4   :  { %1650 = vst.msk [vmem:[%s2512_s10] sm:$0xff] %vm1649_vm11, %v1648_v55 }

</bundles_post_ra>
